<compile_context>
chip_gen: v7x
topology: tpu7x:2x2x1
jax: 0.10.0
libtpu: 0.0.40
codegen_flags: <defaults>
</compile_context>

<pallas_src>
import jax
import jax.numpy as jnp
from jax import lax
from jax.experimental import pallas as pl
from jax.experimental.pallas import tpu as pltpu

USE_POSTER = False   # poster branch (Conv/BN/MaxPool/AdaptiveAvgPool) off, as in Model(use_poster=False)
EMB_M = 32           # movie embedding width
FC_SIZES = (128, 64, 32)


def _round_up(x, m):
    return (x + m - 1) // m * m


def _block_diag(*mats):
    rows = sum(m.shape[0] for m in mats)
    cols = sum(m.shape[1] for m in mats)
    out = jnp.zeros((rows, cols), jnp.float32)
    r = c = 0
    for m in mats:
        out = out.at[r:r + m.shape[0], c:c + m.shape[1]].set(m)
        r += m.shape[0]
        c += m.shape[1]
    return out


def _recsys_kernel(front_ref, x0_ref, x1_ref, x2_ref, conv_ref,
                   w_front, b_front, w_comb, b_comb, s_sum,
                   w_f1, b_f1, w_f2, b_f2, w_f3, b_f3,
                   out_ref):
    f32 = jnp.float32
    bf16 = jnp.bfloat16

    def dot(x, w):
        return jnp.dot(x, w, preferred_element_type=f32)   # bf16 in, f32 accumulate

    def relu(x):
        return jnp.maximum(x, 0.0)

    tb = front_ref.shape[0]

    # ---------- fused user gender/age/job FCs + movie category FC (block-diag 80x80)
    front_h = relu(dot(front_ref[...], w_front[...]) + b_front[...])     # [TB,80] f32

    # ---------- movie title conv branch, vectorized over all output positions
    # x{0,1,2}_ref[:, 32h:32h+32] = title-embedding row (2h + k); stride-2 windows
    # pre-split in the wrapper.  Elementwise math in f32.
    x0 = x0_ref[...].astype(f32)                                          # [TB, H1*32]
    x1 = x1_ref[...].astype(f32)
    x2 = x2_ref[...].astype(f32)

    # conv taps as SMEM scalars (no per-use broadcast tables)
    c1w0 = conv_ref[0]; c1w1 = conv_ref[1]; c1w2 = conv_ref[2]; c1b = conv_ref[3]
    c2w0 = conv_ref[4]; c2w1 = conv_ref[5]; c2w2 = conv_ref[6]; c2b = conv_ref[7]

    # Conv2d(1,1,(3,1),stride=(2,1)) + ReLU for every output position at once
    y = relu(c1w0 * x0 + c1w1 * x1 + c1w2 * x2 + c1b)                     # [TB, H1*32]
    H1 = y.shape[1] // EMB_M
    H2 = H1 - 2

    # Conv2d(1,1,(3,1)) window over conv1 positions via static lane-offset slices
    y0 = y[:, 0:H2 * EMB_M]
    y1 = y[:, EMB_M:(H2 + 1) * EMB_M]
    y2 = y[:, 2 * EMB_M:(H2 + 2) * EMB_M]
    z = relu(c2w0 * y0 + c2w1 * y1 + c2w2 * y2 + c2b)                     # [TB, H2*32]

    # sum over H (lane groups of 32) as a tiny MXU matmul against a tiled identity
    tit_h = relu(dot(z.astype(bf16), s_sum[...]))                         # [TB,32]

    # ---------- single fused usr_combined | mov_combined matmul, K padded to 128
    comb_in = jnp.concatenate(
        [front_h, tit_h, jnp.zeros((tb, 16), f32)], axis=1).astype(bf16)  # [TB,128]
    comb = jnp.tanh(dot(comb_in, w_comb[...]) + b_comb[...])              # [TB,512] = [usr|pad|mov|pad]

    # ---------- fused fc towers (block-diag, lane-aligned widths): 512->256->128->64
    hid = relu(dot(comb.astype(bf16), w_f1[...]) + b_f1[...])             # [TB,256]
    hid = relu(dot(hid.astype(bf16), w_f2[...]) + b_f2[...])              # [TB,128]
    hid = relu(dot(hid.astype(bf16), w_f3[...]) + b_f3[...])              # [TB,64] = [u | m]

    u = hid[:, 0:32]
    m = hid[:, 32:64]

    # ---------- cosine similarity * 5 (dim=1, eps=1e-8, per-norm clamp)
    eps2 = jnp.float32(1e-16)
    dotp = jnp.sum(u * m, axis=1, keepdims=True)
    nu2 = jnp.sum(u * u, axis=1, keepdims=True)
    nm2 = jnp.sum(m * m, axis=1, keepdims=True)
    inv = lax.rsqrt(jnp.maximum(nu2, eps2)) * lax.rsqrt(jnp.maximum(nm2, eps2))
    sim5 = dotp * inv * 5.0                                               # [TB,1]

    # ---------- lane-dense output slab: [u | m | sim broadcast] -> one full store
    out_ref[...] = jnp.concatenate([hid, jnp.broadcast_to(sim5, (tb, 64))], axis=1)


def init_params(key, max_age=56, max_job=20, max_cat=18, max_tit=500):
    ks = iter(jax.random.split(key, 64))

    def nrm(shape, scale=0.1):
        return (scale * jax.random.normal(next(ks), shape)).astype(jnp.float32)

    p = {}
    # embedding tables
    p["usr_gender_emb"] = nrm((2, 16), 1.0)
    p["usr_age_emb"] = nrm((max_age + 1, 16), 1.0)
    p["usr_job_emb"] = nrm((max_job + 1, 16), 1.0)
    p["mov_cat_emb"] = nrm((max_cat + 1, 32), 1.0)
    p["mov_tit_emb"] = nrm((max_tit + 1, 32), 1.0)

    def linear(name, fin, fout):
        p["w_" + name] = nrm((fin, fout))      # stored [in, out]
        p["b_" + name] = nrm((1, fout))

    linear("usr_gender_fc", 16, 16)
    linear("usr_age_fc", 16, 16)
    linear("usr_job_fc", 16, 16)
    linear("usr_combined", 48, 200)
    linear("mov_cat_fc", 32, 32)
    linear("mov_combined", 64, 200)
    fin = 200
    for i, fout in enumerate(FC_SIZES):
        linear(f"usr_fc{i}", fin, fout)
        linear(f"mov_fc{i}", fin, fout)
        fin = fout

    # Conv2d(1,1,(3,1)) == 3 taps + scalar bias
    p["tit_conv1_w"] = nrm((3,))
    p["tit_conv1_b"] = nrm((1,))
    p["tit_conv2_w"] = nrm((3,))
    p["tit_conv2_b"] = nrm((1,))
    # TODO(synk): mov_poster_conv (Conv2d/BatchNorm2d/MaxPool2d/AdaptiveAvgPool2d)
    # not implemented — use_poster=False path only.
    return p


def _fuse_params(p, H2):
    """Build the fused (block-diagonal / padded / bf16) kernel parameters."""
    bf16 = jnp.bfloat16
    f = {}

    # front: [gender16|age16|job16|cat32] -> block-diag [80,80]
    f["w_front"] = _block_diag(p["w_usr_gender_fc"], p["w_usr_age_fc"],
                               p["w_usr_job_fc"], p["w_mov_cat_fc"]).astype(bf16)
    f["b_front"] = jnp.concatenate([p["b_usr_gender_fc"], p["b_usr_age_fc"],
                                    p["b_usr_job_fc"], p["b_mov_cat_fc"]], axis=1)   # [1,80] f32

    # combined layer: K padded to 128, output padded 400 -> 512 lanes
    w_comb = jnp.zeros((128, 512), jnp.float32)
    w_comb = w_comb.at[0:48, 0:200].set(p["w_usr_combined"])          # usr 48 -> 200
    w_comb = w_comb.at[48:80, 256:456].set(p["w_mov_combined"][0:32]) # mov (cat part)
    w_comb = w_comb.at[80:112, 256:456].set(p["w_mov_combined"][32:64])  # mov (title part)
    f["w_comb"] = w_comb.astype(bf16)
    b_comb = jnp.zeros((1, 512), jnp.float32)
    b_comb = b_comb.at[:, 0:200].set(p["b_usr_combined"])
    b_comb = b_comb.at[:, 256:456].set(p["b_mov_combined"])
    f["b_comb"] = b_comb

    # fc1: [512,256] with zero rows on the padded comb lanes
    w_f1 = jnp.zeros((512, 256), jnp.float32)
    w_f1 = w_f1.at[0:200, 0:128].set(p["w_usr_fc0"])
    w_f1 = w_f1.at[256:456, 128:256].set(p["w_mov_fc0"])
    f["w_f1"] = w_f1.astype(bf16)
    f["b_f1"] = jnp.concatenate([p["b_usr_fc0"], p["b_mov_fc0"]], axis=1)

    f["w_f2"] = _block_diag(p["w_usr_fc1"], p["w_mov_fc1"]).astype(bf16)   # [256,128]
    f["b_f2"] = jnp.concatenate([p["b_usr_fc1"], p["b_mov_fc1"]], axis=1)
    f["w_f3"] = _block_diag(p["w_usr_fc2"], p["w_mov_fc2"]).astype(bf16)   # [128,64]
    f["b_f3"] = jnp.concatenate([p["b_usr_fc2"], p["b_mov_fc2"]], axis=1)

    # conv taps -> SMEM (8,) f32 vector: [c1w0,c1w1,c1w2,c1b, c2w0,c2w1,c2w2,c2b]
    f["conv_taps"] = jnp.concatenate([p["tit_conv1_w"], p["tit_conv1_b"],
                                      p["tit_conv2_w"], p["tit_conv2_b"]],
                                     axis=0).astype(jnp.float32)

    # H-sum matrix: [H2*32, 32], tiled identity (sum over title positions on MXU)
    f["s_sum"] = jnp.tile(jnp.eye(EMB_M, dtype=jnp.float32), (H2, 1)).astype(bf16)
    return f


def recommender_forward(usr_var, mov_var, params, *, tile_b=1024):
    usr_gender, usr_age, usr_job = usr_var
    mov_cat, mov_title, _mov_poster = mov_var   # poster ignored (use_poster=False)
    B = usr_gender.shape[0]
    bf16 = jnp.bfloat16

    # ---- embedding gathers + cheap reductions (glue, plain JAX/XLA) ----
    gaj = jnp.concatenate([params["usr_gender_emb"][usr_gender],
                           params["usr_age_emb"][usr_age],
                           params["usr_job_emb"][usr_job]], axis=1)          # [B,48]
    cat = jnp.sum(params["mov_cat_emb"][mov_cat], axis=1)                    # [B,32]
    front = jnp.concatenate([gaj, cat], axis=1).astype(bf16)                 # [B,80] bf16

    tit = params["mov_tit_emb"][mov_title[:, 0, :]]                          # [B,L,32]
    L = tit.shape[1]
    H1 = (L - 3) // 2 + 1
    H2 = H1 - 2
    assert H2 >= 1, "title length too short for the two stacked convs"
    # pre-split the stride-2 conv windows; ship bf16 to halve the dominant HBM stream
    x0 = tit[:, 0:2 * H1 - 1:2, :].reshape(B, H1 * EMB_M).astype(bf16)
    x1 = tit[:, 1:2 * H1:2, :].reshape(B, H1 * EMB_M).astype(bf16)
    x2 = tit[:, 2:2 * H1 + 1:2, :].reshape(B, H1 * EMB_M).astype(bf16)

    fused = _fuse_params(params, H2)

    # ---- batch tiling (TB multiple of 16 for bf16 sublane packing) ----
    TB = _round_up(min(tile_b, B), 16)
    if B >= 256 and _round_up(B, TB) // TB < 2:
        TB = _round_up(-(-B // 2), 16)        # >=2 grid steps -> v7x megacore can shard
    Bp = _round_up(B, TB)
    pad = Bp - B
    if pad:
        front = jnp.pad(front, ((0, pad), (0, 0)))
        x0 = jnp.pad(x0, ((0, pad), (0, 0)))
        x1 = jnp.pad(x1, ((0, pad), (0, 0)))
        x2 = jnp.pad(x2, ((0, pad), (0, 0)))

    act_args = [front, x0, x1, x2]
    wgt_args = [fused["w_front"], fused["b_front"], fused["w_comb"], fused["b_comb"],
                fused["s_sum"], fused["w_f1"], fused["b_f1"],
                fused["w_f2"], fused["b_f2"], fused["w_f3"], fused["b_f3"]]

    in_specs = (
        [pl.BlockSpec((TB, a.shape[1]), lambda i: (i, 0)) for a in act_args]
        + [pl.BlockSpec(memory_space=pltpu.MemorySpace.SMEM)]     # conv taps (8,) scalars
        + [pl.BlockSpec(w.shape, lambda i: (0, 0)) for w in wgt_args]
    )

    slab = pl.pallas_call(
        _recsys_kernel,
        out_shape=jax.ShapeDtypeStruct((Bp, 128), jnp.float32),
        grid=(Bp // TB,),
        in_specs=in_specs,
        out_specs=pl.BlockSpec((TB, 128), lambda i: (i, 0)),
        compiler_params=pltpu.CompilerParams(
            dimension_semantics=("parallel",),
            vmem_limit_bytes=32 * 1024 * 1024,
        ),
    )(*(act_args + [fused["conv_taps"]] + wgt_args))

    usr_feat = slab[:B, 0:32]
    mov_feat = slab[:B, 32:64]
    sim = slab[:B, 64]
    return usr_feat, mov_feat, sim


if __name__ == "__main__":
    key = jax.random.PRNGKey(0)
    kp, k1, k2, k3, k4, k5 = jax.random.split(key, 6)

    B, N_CAT, L = 4, 6, 15
    MAX_AGE, MAX_JOB, MAX_CAT, MAX_TIT = 56, 20, 18, 500

    params = init_params(kp, MAX_AGE, MAX_JOB, MAX_CAT, MAX_TIT)

    usr_gender = jax.random.randint(k1, (B,), 0, 2)
    usr_age = jax.random.randint(k2, (B,), 0, MAX_AGE + 1)
    usr_job = jax.random.randint(k3, (B,), 0, MAX_JOB + 1)
    mov_cat = jax.random.randint(k4, (B, N_CAT), 0, MAX_CAT + 1)
    mov_title = jax.random.randint(k5, (B, 1, L), 0, MAX_TIT + 1)
    mov_poster = None  # use_poster=False

    usr_feat, mov_feat, sim = recommender_forward(
        (usr_gender, usr_age, usr_job),
        (mov_cat, mov_title, mov_poster),
        params,
    )
    jax.block_until_ready((usr_feat, mov_feat, sim))

    assert usr_feat.shape == (B, 32) and mov_feat.shape == (B, 32) and sim.shape == (B,)
    assert bool(jnp.all(jnp.isfinite(sim)))
    print("KERNEL_OK")
</pallas_src>

<mosaic_0001>
module attributes {stable_mosaic.version = 11 : i64} {
  func.func @_recsys_kernel(%arg0: i32, %arg1: memref<16x80xbf16, #tpu.memory_space<vmem>>, %arg2: memref<16x224xbf16, #tpu.memory_space<vmem>>, %arg3: memref<16x224xbf16, #tpu.memory_space<vmem>>, %arg4: memref<16x224xbf16, #tpu.memory_space<vmem>>, %arg5: memref<8xf32, #tpu.memory_space<smem>>, %arg6: memref<80x80xbf16, #tpu.memory_space<vmem>>, %arg7: memref<1x80xf32, #tpu.memory_space<vmem>>, %arg8: memref<128x512xbf16, #tpu.memory_space<vmem>>, %arg9: memref<1x512xf32, #tpu.memory_space<vmem>>, %arg10: memref<160x32xbf16, #tpu.memory_space<vmem>>, %arg11: memref<512x256xbf16, #tpu.memory_space<vmem>>, %arg12: memref<1x256xf32, #tpu.memory_space<vmem>>, %arg13: memref<256x128xbf16, #tpu.memory_space<vmem>>, %arg14: memref<1x128xf32, #tpu.memory_space<vmem>>, %arg15: memref<128x64xbf16, #tpu.memory_space<vmem>>, %arg16: memref<1x64xf32, #tpu.memory_space<vmem>>, %arg17: memref<16x128xf32, #tpu.memory_space<vmem>>) attributes {dimension_semantics = [#tpu.dimension_semantics<parallel>], iteration_bounds = array<i64: 1>, scalar_prefetch = 0 : i64, scratch_operands = 0 : i64, tpu.core_type = #tpu.core_type<tc>, window_params = [{transform_indices = @transform_0, window_bounds = array<i64: 16, 80>}, {transform_indices = @transform_1, window_bounds = array<i64: 16, 224>}, {transform_indices = @transform_2, window_bounds = array<i64: 16, 224>}, {transform_indices = @transform_3, window_bounds = array<i64: 16, 224>}, {transform_indices = @transform_4, window_bounds = array<i64: 8>}, {pipeline_mode = #tpu.pipeline_mode<synchronous>, transform_indices = @transform_5, window_bounds = array<i64: 80, 80>}, {pipeline_mode = #tpu.pipeline_mode<synchronous>, transform_indices = @transform_6, window_bounds = array<i64: 1, 80>}, {pipeline_mode = #tpu.pipeline_mode<synchronous>, transform_indices = @transform_7, window_bounds = array<i64: 128, 512>}, {pipeline_mode = #tpu.pipeline_mode<synchronous>, transform_indices = @transform_8, window_bounds = array<i64: 1, 512>}, {pipeline_mode = #tpu.pipeline_mode<synchronous>, transform_indices = @transform_9, window_bounds = array<i64: 160, 32>}, {pipeline_mode = #tpu.pipeline_mode<synchronous>, transform_indices = @transform_10, window_bounds = array<i64: 512, 256>}, {pipeline_mode = #tpu.pipeline_mode<synchronous>, transform_indices = @transform_11, window_bounds = array<i64: 1, 256>}, {pipeline_mode = #tpu.pipeline_mode<synchronous>, transform_indices = @transform_12, window_bounds = array<i64: 256, 128>}, {pipeline_mode = #tpu.pipeline_mode<synchronous>, transform_indices = @transform_13, window_bounds = array<i64: 1, 128>}, {pipeline_mode = #tpu.pipeline_mode<synchronous>, transform_indices = @transform_14, window_bounds = array<i64: 128, 64>}, {pipeline_mode = #tpu.pipeline_mode<synchronous>, transform_indices = @transform_15, window_bounds = array<i64: 1, 64>}, {transform_indices = @transform_16, window_bounds = array<i64: 16, 128>}]} {
    %c0 = arith.constant 0 : index
    %c0_0 = arith.constant 0 : index
    %0 = vector.load %arg1[%c0, %c0_0] : memref<16x80xbf16, #tpu.memory_space<vmem>>, vector<16x80xbf16>
    %c0_1 = arith.constant 0 : index
    %c0_2 = arith.constant 0 : index
    %1 = vector.load %arg6[%c0_1, %c0_2] : memref<80x80xbf16, #tpu.memory_space<vmem>>, vector<80x80xbf16>
    %cst = arith.constant dense<0.000000e+00> : vector<16x80xf32>
    %2 = tpu.matmul %0, %1, %cst {dimension_numbers = #tpu.dot_dimension_numbers<[1], [0], [0], [1], [0, 0, 1, 1], [], []>} : vector<16x80xbf16>, vector<80x80xbf16>, vector<16x80xf32> -> vector<16x80xf32>
    %c0_3 = arith.constant 0 : index
    %c0_4 = arith.constant 0 : index
    %3 = vector.load %arg7[%c0_3, %c0_4] : memref<1x80xf32, #tpu.memory_space<vmem>>, vector<1x80xf32>
    %4 = vector.broadcast %3 : vector<1x80xf32> to vector<16x80xf32>
    %5 = arith.addf %2, %4 : vector<16x80xf32>
    %cst_5 = arith.constant 0.000000e+00 : f32
    %6 = vector.broadcast %cst_5 : f32 to vector<16x80xf32>
    %7 = arith.maximumf %5, %6 : vector<16x80xf32>
    %c0_6 = arith.constant 0 : index
    %c0_7 = arith.constant 0 : index
    %8 = vector.load %arg2[%c0_6, %c0_7] : memref<16x224xbf16, #tpu.memory_space<vmem>>, vector<16x224xbf16>
    %9 = arith.extf %8 : vector<16x224xbf16> to vector<16x224xf32>
    %c0_8 = arith.constant 0 : index
    %c0_9 = arith.constant 0 : index
    %10 = vector.load %arg3[%c0_8, %c0_9] : memref<16x224xbf16, #tpu.memory_space<vmem>>, vector<16x224xbf16>
    %11 = arith.extf %10 : vector<16x224xbf16> to vector<16x224xf32>
    %c0_10 = arith.constant 0 : index
    %c0_11 = arith.constant 0 : index
    %12 = vector.load %arg4[%c0_10, %c0_11] : memref<16x224xbf16, #tpu.memory_space<vmem>>, vector<16x224xbf16>
    %13 = arith.extf %12 : vector<16x224xbf16> to vector<16x224xf32>
    %c0_12 = arith.constant 0 : index
    %14 = memref.load %arg5[%c0_12] : memref<8xf32, #tpu.memory_space<smem>>
    %c1 = arith.constant 1 : index
    %15 = memref.load %arg5[%c1] : memref<8xf32, #tpu.memory_space<smem>>
    %c2 = arith.constant 2 : index
    %16 = memref.load %arg5[%c2] : memref<8xf32, #tpu.memory_space<smem>>
    %c3 = arith.constant 3 : index
    %17 = memref.load %arg5[%c3] : memref<8xf32, #tpu.memory_space<smem>>
    %c4 = arith.constant 4 : index
    %18 = memref.load %arg5[%c4] : memref<8xf32, #tpu.memory_space<smem>>
    %c5 = arith.constant 5 : index
    %19 = memref.load %arg5[%c5] : memref<8xf32, #tpu.memory_space<smem>>
    %c6 = arith.constant 6 : index
    %20 = memref.load %arg5[%c6] : memref<8xf32, #tpu.memory_space<smem>>
    %c7 = arith.constant 7 : index
    %21 = memref.load %arg5[%c7] : memref<8xf32, #tpu.memory_space<smem>>
    %22 = vector.broadcast %14 : f32 to vector<16x224xf32>
    %23 = arith.mulf %22, %9 : vector<16x224xf32>
    %24 = vector.broadcast %15 : f32 to vector<16x224xf32>
    %25 = arith.mulf %24, %11 : vector<16x224xf32>
    %26 = arith.addf %23, %25 : vector<16x224xf32>
    %27 = vector.broadcast %16 : f32 to vector<16x224xf32>
    %28 = arith.mulf %27, %13 : vector<16x224xf32>
    %29 = arith.addf %26, %28 : vector<16x224xf32>
    %30 = vector.broadcast %17 : f32 to vector<16x224xf32>
    %31 = arith.addf %29, %30 : vector<16x224xf32>
    %cst_13 = arith.constant 0.000000e+00 : f32
    %32 = vector.broadcast %cst_13 : f32 to vector<16x224xf32>
    %33 = arith.maximumf %31, %32 : vector<16x224xf32>
    %34 = vector.extract_strided_slice %33 {offsets = [0, 0], sizes = [16, 160], strides = [1, 1]} : vector<16x224xf32> to vector<16x160xf32>
    %35 = vector.extract_strided_slice %33 {offsets = [0, 32], sizes = [16, 160], strides = [1, 1]} : vector<16x224xf32> to vector<16x160xf32>
    %36 = vector.extract_strided_slice %33 {offsets = [0, 64], sizes = [16, 160], strides = [1, 1]} : vector<16x224xf32> to vector<16x160xf32>
    %37 = vector.broadcast %18 : f32 to vector<16x160xf32>
    %38 = arith.mulf %37, %34 : vector<16x160xf32>
    %39 = vector.broadcast %19 : f32 to vector<16x160xf32>
    %40 = arith.mulf %39, %35 : vector<16x160xf32>
    %41 = arith.addf %38, %40 : vector<16x160xf32>
    %42 = vector.broadcast %20 : f32 to vector<16x160xf32>
    %43 = arith.mulf %42, %36 : vector<16x160xf32>
    %44 = arith.addf %41, %43 : vector<16x160xf32>
    %45 = vector.broadcast %21 : f32 to vector<16x160xf32>
    %46 = arith.addf %44, %45 : vector<16x160xf32>
    %cst_14 = arith.constant 0.000000e+00 : f32
    %47 = vector.broadcast %cst_14 : f32 to vector<16x160xf32>
    %48 = arith.maximumf %46, %47 : vector<16x160xf32>
    %49 = arith.truncf %48 : vector<16x160xf32> to vector<16x160xbf16>
    %c0_15 = arith.constant 0 : index
    %c0_16 = arith.constant 0 : index
    %50 = vector.load %arg10[%c0_15, %c0_16] : memref<160x32xbf16, #tpu.memory_space<vmem>>, vector<160x32xbf16>
    %cst_17 = arith.constant dense<0.000000e+00> : vector<16x32xf32>
    %51 = tpu.matmul %49, %50, %cst_17 {dimension_numbers = #tpu.dot_dimension_numbers<[1], [0], [0], [1], [0, 0, 1, 1], [], []>} : vector<16x160xbf16>, vector<160x32xbf16>, vector<16x32xf32> -> vector<16x32xf32>
    %cst_18 = arith.constant 0.000000e+00 : f32
    %52 = vector.broadcast %cst_18 : f32 to vector<16x32xf32>
    %53 = arith.maximumf %51, %52 : vector<16x32xf32>
    %cst_19 = arith.constant 0.000000e+00 : f32
    %54 = vector.broadcast %cst_19 : f32 to vector<16x16xf32>
    %55 = tpu.concatenate %7, %53, %54 in 1 : vector<16x80xf32>, vector<16x32xf32>, vector<16x16xf32> -> vector<16x128xf32>
    %56 = arith.truncf %55 : vector<16x128xf32> to vector<16x128xbf16>
    %c0_20 = arith.constant 0 : index
    %c0_21 = arith.constant 0 : index
    %57 = vector.load %arg8[%c0_20, %c0_21] : memref<128x512xbf16, #tpu.memory_space<vmem>>, vector<128x512xbf16>
    %cst_22 = arith.constant dense<0.000000e+00> : vector<16x512xf32>
    %58 = tpu.matmul %56, %57, %cst_22 {dimension_numbers = #tpu.dot_dimension_numbers<[1], [0], [0], [1], [0, 0, 1, 1], [], []>} : vector<16x128xbf16>, vector<128x512xbf16>, vector<16x512xf32> -> vector<16x512xf32>
    %c0_23 = arith.constant 0 : index
    %c0_24 = arith.constant 0 : index
    %59 = vector.load %arg9[%c0_23, %c0_24] : memref<1x512xf32, #tpu.memory_space<vmem>>, vector<1x512xf32>
    %60 = vector.broadcast %59 : vector<1x512xf32> to vector<16x512xf32>
    %61 = arith.addf %58, %60 : vector<16x512xf32>
    %62 = math.tanh %61 : vector<16x512xf32>
    %63 = arith.truncf %62 : vector<16x512xf32> to vector<16x512xbf16>
    %c0_25 = arith.constant 0 : index
    %c0_26 = arith.constant 0 : index
    %64 = vector.load %arg11[%c0_25, %c0_26] : memref<512x256xbf16, #tpu.memory_space<vmem>>, vector<512x256xbf16>
    %cst_27 = arith.constant dense<0.000000e+00> : vector<16x256xf32>
    %65 = tpu.matmul %63, %64, %cst_27 {dimension_numbers = #tpu.dot_dimension_numbers<[1], [0], [0], [1], [0, 0, 1, 1], [], []>} : vector<16x512xbf16>, vector<512x256xbf16>, vector<16x256xf32> -> vector<16x256xf32>
    %c0_28 = arith.constant 0 : index
    %c0_29 = arith.constant 0 : index
    %66 = vector.load %arg12[%c0_28, %c0_29] : memref<1x256xf32, #tpu.memory_space<vmem>>, vector<1x256xf32>
    %67 = vector.broadcast %66 : vector<1x256xf32> to vector<16x256xf32>
    %68 = arith.addf %65, %67 : vector<16x256xf32>
    %cst_30 = arith.constant 0.000000e+00 : f32
    %69 = vector.broadcast %cst_30 : f32 to vector<16x256xf32>
    %70 = arith.maximumf %68, %69 : vector<16x256xf32>
    %71 = arith.truncf %70 : vector<16x256xf32> to vector<16x256xbf16>
    %c0_31 = arith.constant 0 : index
    %c0_32 = arith.constant 0 : index
    %72 = vector.load %arg13[%c0_31, %c0_32] : memref<256x128xbf16, #tpu.memory_space<vmem>>, vector<256x128xbf16>
    %cst_33 = arith.constant dense<0.000000e+00> : vector<16x128xf32>
    %73 = tpu.matmul %71, %72, %cst_33 {dimension_numbers = #tpu.dot_dimension_numbers<[1], [0], [0], [1], [0, 0, 1, 1], [], []>} : vector<16x256xbf16>, vector<256x128xbf16>, vector<16x128xf32> -> vector<16x128xf32>
    %c0_34 = arith.constant 0 : index
    %c0_35 = arith.constant 0 : index
    %74 = vector.load %arg14[%c0_34, %c0_35] : memref<1x128xf32, #tpu.memory_space<vmem>>, vector<1x128xf32>
    %75 = vector.broadcast %74 : vector<1x128xf32> to vector<16x128xf32>
    %76 = arith.addf %73, %75 : vector<16x128xf32>
    %cst_36 = arith.constant 0.000000e+00 : f32
    %77 = vector.broadcast %cst_36 : f32 to vector<16x128xf32>
    %78 = arith.maximumf %76, %77 : vector<16x128xf32>
    %79 = arith.truncf %78 : vector<16x128xf32> to vector<16x128xbf16>
    %c0_37 = arith.constant 0 : index
    %c0_38 = arith.constant 0 : index
    %80 = vector.load %arg15[%c0_37, %c0_38] : memref<128x64xbf16, #tpu.memory_space<vmem>>, vector<128x64xbf16>
    %cst_39 = arith.constant dense<0.000000e+00> : vector<16x64xf32>
    %81 = tpu.matmul %79, %80, %cst_39 {dimension_numbers = #tpu.dot_dimension_numbers<[1], [0], [0], [1], [0, 0, 1, 1], [], []>} : vector<16x128xbf16>, vector<128x64xbf16>, vector<16x64xf32> -> vector<16x64xf32>
    %c0_40 = arith.constant 0 : index
    %c0_41 = arith.constant 0 : index
    %82 = vector.load %arg16[%c0_40, %c0_41] : memref<1x64xf32, #tpu.memory_space<vmem>>, vector<1x64xf32>
    %83 = vector.broadcast %82 : vector<1x64xf32> to vector<16x64xf32>
    %84 = arith.addf %81, %83 : vector<16x64xf32>
    %cst_42 = arith.constant 0.000000e+00 : f32
    %85 = vector.broadcast %cst_42 : f32 to vector<16x64xf32>
    %86 = arith.maximumf %84, %85 : vector<16x64xf32>
    %87 = vector.extract_strided_slice %86 {offsets = [0, 0], sizes = [16, 32], strides = [1, 1]} : vector<16x64xf32> to vector<16x32xf32>
    %88 = vector.extract_strided_slice %86 {offsets = [0, 32], sizes = [16, 32], strides = [1, 1]} : vector<16x64xf32> to vector<16x32xf32>
    %89 = arith.mulf %87, %88 : vector<16x32xf32>
    %cst_43 = arith.constant dense<0.000000e+00> : vector<16xf32>
    %90 = vector.multi_reduction <add>, %89, %cst_43 [1] : vector<16x32xf32> to vector<16xf32>
    %91 = vector.shape_cast %90 : vector<16xf32> to vector<16x1xf32>
    %92 = arith.mulf %87, %87 : vector<16x32xf32>
    %cst_44 = arith.constant dense<0.000000e+00> : vector<16xf32>
    %93 = vector.multi_reduction <add>, %92, %cst_44 [1] : vector<16x32xf32> to vector<16xf32>
    %94 = vector.shape_cast %93 : vector<16xf32> to vector<16x1xf32>
    %95 = arith.mulf %88, %88 : vector<16x32xf32>
    %cst_45 = arith.constant dense<0.000000e+00> : vector<16xf32>
    %96 = vector.multi_reduction <add>, %95, %cst_45 [1] : vector<16x32xf32> to vector<16xf32>
    %97 = vector.shape_cast %96 : vector<16xf32> to vector<16x1xf32>
    %cst_46 = arith.constant 1.000000e-16 : f32
    %98 = vector.broadcast %cst_46 : f32 to vector<16x1xf32>
    %99 = arith.maximumf %94, %98 : vector<16x1xf32>
    %100 = math.rsqrt %99 : vector<16x1xf32>
    %cst_47 = arith.constant 1.000000e-16 : f32
    %101 = vector.broadcast %cst_47 : f32 to vector<16x1xf32>
    %102 = arith.maximumf %97, %101 : vector<16x1xf32>
    %103 = math.rsqrt %102 : vector<16x1xf32>
    %104 = arith.mulf %100, %103 : vector<16x1xf32>
    %105 = arith.mulf %91, %104 : vector<16x1xf32>
    %cst_48 = arith.constant 5.000000e+00 : f32
    %106 = vector.broadcast %cst_48 : f32 to vector<16x1xf32>
    %107 = arith.mulf %105, %106 : vector<16x1xf32>
    %108 = vector.shape_cast %107 : vector<16x1xf32> to vector<16x1xf32>
    %109 = vector.broadcast %108 : vector<16x1xf32> to vector<16x64xf32>
    %110 = tpu.concatenate %86, %109 in 1 : vector<16x64xf32>, vector<16x64xf32> -> vector<16x128xf32>
    %c0_49 = arith.constant 0 : index
    %c0_50 = arith.constant 0 : index
    %111 = vector.load %arg17[%c0_49, %c0_50] : memref<16x128xf32, #tpu.memory_space<vmem>>, vector<16x128xf32>
    tpu.vector_store %arg17[%c0_49, %c0_50], %110 {strides = array<i32>} : memref<16x128xf32, #tpu.memory_space<vmem>>, vector<16x128xf32>,
    return
  }
  func.func @transform_0(%arg0: i32) -> (i32, i32) {
    %c0_i32 = arith.constant 0 : i32
    %c0_i32_0 = arith.constant 0 : i32
    return %arg0, %c0_i32 : i32, i32
  }
  func.func @transform_1(%arg0: i32) -> (i32, i32) {
    %c0_i32 = arith.constant 0 : i32
    %c0_i32_0 = arith.constant 0 : i32
    return %arg0, %c0_i32 : i32, i32
  }
  func.func @transform_2(%arg0: i32) -> (i32, i32) {
    %c0_i32 = arith.constant 0 : i32
    %c0_i32_0 = arith.constant 0 : i32
    return %arg0, %c0_i32 : i32, i32
  }
  func.func @transform_3(%arg0: i32) -> (i32, i32) {
    %c0_i32 = arith.constant 0 : i32
    %c0_i32_0 = arith.constant 0 : i32
    return %arg0, %c0_i32 : i32, i32
  }
  func.func @transform_4(%arg0: i32) -> i32 {
    %c0_i32 = arith.constant 0 : i32
    %c0_i32_0 = arith.constant 0 : i32
    return %c0_i32 : i32
  }
  func.func @transform_5(%arg0: i32) -> (i32, i32) {
    %c0_i32 = arith.constant 0 : i32
    %c0_i32_0 = arith.constant 0 : i32
    %c0_i32_1 = arith.constant 0 : i32
    return %c0_i32, %c0_i32_0 : i32, i32
  }
  func.func @transform_6(%arg0: i32) -> (i32, i32) {
    %c0_i32 = arith.constant 0 : i32
    %c0_i32_0 = arith.constant 0 : i32
    %c0_i32_1 = arith.constant 0 : i32
    return %c0_i32, %c0_i32_0 : i32, i32
  }
  func.func @transform_7(%arg0: i32) -> (i32, i32) {
    %c0_i32 = arith.constant 0 : i32
    %c0_i32_0 = arith.constant 0 : i32
    %c0_i32_1 = arith.constant 0 : i32
    return %c0_i32, %c0_i32_0 : i32, i32
  }
  func.func @transform_8(%arg0: i32) -> (i32, i32) {
    %c0_i32 = arith.constant 0 : i32
    %c0_i32_0 = arith.constant 0 : i32
    %c0_i32_1 = arith.constant 0 : i32
    return %c0_i32, %c0_i32_0 : i32, i32
  }
  func.func @transform_9(%arg0: i32) -> (i32, i32) {
    %c0_i32 = arith.constant 0 : i32
    %c0_i32_0 = arith.constant 0 : i32
    %c0_i32_1 = arith.constant 0 : i32
    return %c0_i32, %c0_i32_0 : i32, i32
  }
  func.func @transform_10(%arg0: i32) -> (i32, i32) {
    %c0_i32 = arith.constant 0 : i32
    %c0_i32_0 = arith.constant 0 : i32
    %c0_i32_1 = arith.constant 0 : i32
    return %c0_i32, %c0_i32_0 : i32, i32
  }
  func.func @transform_11(%arg0: i32) -> (i32, i32) {
    %c0_i32 = arith.constant 0 : i32
    %c0_i32_0 = arith.constant 0 : i32
    %c0_i32_1 = arith.constant 0 : i32
    return %c0_i32, %c0_i32_0 : i32, i32
  }
  func.func @transform_12(%arg0: i32) -> (i32, i32) {
    %c0_i32 = arith.constant 0 : i32
    %c0_i32_0 = arith.constant 0 : i32
    %c0_i32_1 = arith.constant 0 : i32
    return %c0_i32, %c0_i32_0 : i32, i32
  }
  func.func @transform_13(%arg0: i32) -> (i32, i32) {
    %c0_i32 = arith.constant 0 : i32
    %c0_i32_0 = arith.constant 0 : i32
    %c0_i32_1 = arith.constant 0 : i32
    return %c0_i32, %c0_i32_0 : i32, i32
  }
  func.func @transform_14(%arg0: i32) -> (i32, i32) {
    %c0_i32 = arith.constant 0 : i32
    %c0_i32_0 = arith.constant 0 : i32
    %c0_i32_1 = arith.constant 0 : i32
    return %c0_i32, %c0_i32_0 : i32, i32
  }
  func.func @transform_15(%arg0: i32) -> (i32, i32) {
    %c0_i32 = arith.constant 0 : i32
    %c0_i32_0 = arith.constant 0 : i32
    %c0_i32_1 = arith.constant 0 : i32
    return %c0_i32, %c0_i32_0 : i32, i32
  }
  func.func @transform_16(%arg0: i32) -> (i32, i32) {
    %c0_i32 = arith.constant 0 : i32
    %c0_i32_0 = arith.constant 0 : i32
    return %arg0, %c0_i32 : i32, i32
  }
}

</mosaic_0001>

<bundles_post_ra>
// kernel: tpu_custom_call.1
= control target key start
LH: loop header
LB: loop body
LE: loop exit
PB: predicated region body
PF: predicated region fallthrough
CT: control target
= control target key end

     0   :  { %s2716_s0 = inlined_call_operand.vmem [shape: bf16[16,80], index: 0, kind: input, shape index: {}]   ;;  %s2717_s1 = inlined_call_operand.vmem [shape: bf16[16,224], index: 1, kind: input, shape index: {}]   ;;  %s2718_s2 = inlined_call_operand.vmem [shape: bf16[16,224], index: 2, kind: input, shape index: {}]   ;;  %s2719_s3 = inlined_call_operand.vmem [shape: bf16[16,224], index: 3, kind: input, shape index: {}]   ;;  %s2720_s4 = inlined_call_operand.vmem [shape: f32[8], index: 4, kind: input, shape index: {}]   ;;  %s2721_s5 = inlined_call_operand.vmem [shape: bf16[80,80], index: 5, kind: input, shape index: {}]   ;;  %s2722_s6 = inlined_call_operand.hbm [shape: f32[1,80], index: 6, kind: input, shape index: {}]   ;;  %s2723_s7 = inlined_call_operand.hbm [shape: bf16[128,512], index: 7, kind: input, shape index: {}]   ;;  %s2724_s8 = inlined_call_operand.vmem [shape: f32[1,512], index: 8, kind: input, shape index: {}]   ;;  %s2725_s9 = inlined_call_operand.vmem [shape: bf16[160,32], index: 9, kind: input, shape index: {}]   ;;  %s2726_s10 = inlined_call_operand.hbm [shape: bf16[512,256], index: 10, kind: input, shape index: {}]   ;;  %s2727_s11 = inlined_call_operand.hbm [shape: f32[1,256], index: 11, kind: input, shape index: {}]   ;;  %s2728_s12 = inlined_call_operand.vmem [shape: bf16[256,128], index: 12, kind: input, shape index: {}]   ;;  %s2729_s13 = inlined_call_operand.hbm [shape: f32[1,128], index: 13, kind: input, shape index: {}]   ;;  %s2730_s14 = inlined_call_operand.vmem [shape: bf16[128,64], index: 14, kind: input, shape index: {}]   ;;  %s2731_s15 = inlined_call_operand.vmem [shape: f32[1,64], index: 15, kind: input, shape index: {}]   ;;  %s2732_s16 = inlined_call_operand.hbm [shape: f32[16,128], index: 16, kind: output, shape index: {}]  }
   0x1   :  { %2734 = sst [smem:[#allocation19_spill]] %s2716_s0 }
   0x2   :  { %2735 = sst [smem:[#allocation20_spill]] %s2731_s15 }
   0x3   :  { %2736 = sst [smem:[#allocation21_spill]] %s2732_s16 }
   0x4   :  { %21 = vsyncpa [#allocation5], 0 }
   0x5   :  { %22 = vsyncpa [#allocation3], 0 }
   0x6   :  { %23 = vsyncpa [#allocation8], 0 }
   0x7   :  { %24 = vsyncpa [#allocation11], 0 }
   0x8   :  { %25 = vsyncpa [#allocation4], 0  ;;  %s2288_s21 = smov [#allocation7]   ;;  %s2134_s25 = scalar_lea.hbm %s2723_s7, 4096 }
   0x9   :  { %s61_s22 = sshll.u32 %s2288_s21, 4  ;;  %p2135_p0 = scmp.ne.s32.totalorder %s2723_s7, %s2134_s25  ;;  %s62_s22 = int_to_ptr.vmem [resolvable:$true] %s61_s22 }
   0xa   :  { %p2138_p1 = scmp.lt.u32.totalorder %s2134_s25, %s2723_s7 }
   0xc   :  { %p2140_p2 = pnand %p2138_p1, %p2135_p0 }
   0xe   :  { %2143 = shalt.err (!%p2140_p2)
}
   0xf   :  { %s2144_s30 = scalar_lea.vmem %s62_s22, 4096  ;;  %p2149_p4 = scmp.lt.s32.totalorder %s62_s22, %s62_s22 }
  0x10   :  { %p2145_p3 = scmp.ne.s32.totalorder %s62_s22, %s2144_s30  ;;  %p2150_p5 = scmp.lt.s32.totalorder %s2144_s30, %s2144_s30 }
  0x12   :  { %p2151_p6 = por %p2150_p5, %p2149_p4 }
  0x14   :  { %p2152_p7 = pnand %p2151_p6, %p2145_p3 }
  0x16   :  { %2155 = shalt.err (!%p2152_p7)
}
  0x17   :  { %s2289_s0 = smov 256   ;;  %s2290_s17 = smov 16  }
  0x18   :  { %67 = dma.hbm_to_vmem [thread:$0]  %s2723_s7, 4096, %s62_s22, [#allocation8], %s2289_s0, %s2289_s0, %s2290_s17  }
  0x19   :  { %s2291_s20 = smov [#allocation10]   ;;  %s40_s25 = sshll.u32 %s2720_s4, 4  ;;  %s41_s25 = int_to_ptr.vmem [resolvable:$true] %s40_s25 }
  0x1a   :  { %s90_s21 = sshll.u32 %s2291_s20, 4  ;;  %s2156_s28 = scalar_lea.hbm %s2727_s11, 32  ;;  %s91_s21 = int_to_ptr.vmem [resolvable:$true] %s90_s21 }
  0x1b   :  { %p2157_p8 = scmp.ne.s32.totalorder %s2727_s11, %s2156_s28  ;;  %p2160_p9 = scmp.lt.u32.totalorder %s2156_s28, %s2727_s11 }
  0x1d   :  { %p2162_p10 = pnand %p2160_p9, %p2157_p8 }
  0x1f   :  { %2165 = shalt.err (!%p2162_p10)
}
  0x20   :  { %s2166_s7 = scalar_lea.vmem %s91_s21, 32  ;;  %p2171_p12 = scmp.lt.s32.totalorder %s91_s21, %s91_s21 }
  0x21   :  { %p2167_p11 = scmp.ne.s32.totalorder %s91_s21, %s2166_s7  ;;  %p2172_p13 = scmp.lt.s32.totalorder %s2166_s7, %s2166_s7 }
  0x23   :  { %p2173_p0 = por %p2172_p13, %p2171_p12 }
  0x25   :  { %p2174_p1 = pnand %p2173_p0, %p2167_p11 }
  0x27   :  { %2177 = shalt.err (!%p2174_p1)
}
  0x28   :  { %93 = dma.hbm_to_vmem [thread:$0]  %s2727_s11, 32, %s91_s21, [#allocation11]  }
  0x29   :  { %s2178_s0 = scalar_lea.vmem %s41_s25, 16  ;;  %p2183_p3 = scmp.lt.s32.totalorder %s41_s25, %s41_s25 }
  0x2a   :  { %p2179_p2 = scmp.ne.s32.totalorder %s41_s25, %s2178_s0  ;;  %p2184_p4 = scmp.lt.s32.totalorder %s2178_s0, %s2178_s0 }
  0x2c   :  { %p2185_p5 = por %p2184_p4, %p2183_p3 }
  0x2e   :  { %p2186_p6 = pnand %p2185_p5, %p2179_p2 }
  0x30   :  { %2189 = shalt.err (!%p2186_p6)
}
  0x31   :  { %s2292_s15 = smov [#allocation2]   ;;  %s2293_s16 = smov [#allocation6]  }
  0x32   :  { %43 = dma.vmem_to_smem %s41_s25, 16, %s2292_s15, [#allocation5]  }
  0x33   :  { %s52_s17 = sshll.u32 %s2293_s16, 4  ;;  %s2294_s18 = smov [#allocation9]   ;;  %s53_s17 = int_to_ptr.vmem [resolvable:$true] %s52_s17 }
  0x34   :  { %s77_s19 = sshll.u32 %s2294_s18, 4  ;;  %s2190_s24 = scalar_lea.hbm %s2722_s6, 16  ;;  %s78_s19 = int_to_ptr.vmem [resolvable:$true] %s77_s19 }
  0x35   :  { %p2191_p7 = scmp.ne.s32.totalorder %s2722_s6, %s2190_s24  ;;  %p2194_p8 = scmp.lt.u32.totalorder %s2190_s24, %s2722_s6 }
  0x37   :  { %p2196_p9 = pnand %p2194_p8, %p2191_p7 }
  0x39   :  { %2199 = shalt.err (!%p2196_p9)
}
  0x3a   :  { %s2200_s25 = scalar_lea.vmem %s53_s17, 16  ;;  %s2204_s28 = scalar_lea.vmem %s53_s17, 32 }
  0x3b   :  { %p2201_p10 = scmp.ne.s32.totalorder %s53_s17, %s2200_s25  ;;  %p2205_p11 = scmp.lt.s32.totalorder %s53_s17, %s53_s17 }
  0x3c   :  { %p2206_p12 = scmp.lt.s32.totalorder %s2204_s28, %s2200_s25 }
  0x3e   :  { %p2207_p13 = por %p2206_p12, %p2205_p11 }
  0x40   :  { %p2208_p0 = pnand %p2207_p13, %p2201_p10 }
  0x42   :  { %2211 = shalt.err (!%p2208_p0)
}
  0x43   :  { %55 = dma.hbm_to_vmem [thread:$0]  %s2722_s6, 16, %s53_s17, [#allocation3]  }
  0x44   :  { %s2212_s22 = scalar_lea.hbm %s2726_s10, 8192 }
  0x45   :  { %p2213_p1 = scmp.ne.s32.totalorder %s2726_s10, %s2212_s22  ;;  %p2216_p2 = scmp.lt.u32.totalorder %s2212_s22, %s2726_s10 }
  0x47   :  { %p2218_p3 = pnand %p2216_p2, %p2213_p1 }
  0x49   :  { %2221 = shalt.err (!%p2218_p3)
}
  0x4a   :  { %s2222_s20 = scalar_lea.vmem %s78_s19, 8192  ;;  %p2227_p5 = scmp.lt.s32.totalorder %s78_s19, %s78_s19 }
  0x4b   :  { %p2223_p4 = scmp.ne.s32.totalorder %s78_s19, %s2222_s20  ;;  %p2228_p6 = scmp.lt.s32.totalorder %s2222_s20, %s2222_s20 }
  0x4d   :  { %p2229_p7 = por %p2228_p6, %p2227_p5 }
  0x4f   :  { %p2230_p8 = pnand %p2229_p7, %p2223_p4 }
  0x51   :  { %2233 = shalt.err (!%p2230_p8)
}
  0x52   :  { %s2295_s6 = smov 128   ;;  %s2296_s17 = smov 8  }
  0x53   :  { %83 = dma.hbm_to_vmem [thread:$0]  %s2726_s10, 8192, %s78_s19, [#allocation8], %s2295_s6, %s2295_s6, %s2296_s17  }
  0x54   :  { %s2297_s26 = smov [#allocation12]   ;;  %s2234_s25 = scalar_lea.hbm %s2729_s13, 16 }
  0x55   :  { %s102_s11 = sshll.u32 %s2297_s26, 4  ;;  %p2235_p9 = scmp.ne.s32.totalorder %s2729_s13, %s2234_s25  ;;  %s103_s11 = int_to_ptr.vmem [resolvable:$true] %s102_s11 }
  0x56   :  { %p2238_p10 = scmp.lt.u32.totalorder %s2234_s25, %s2729_s13 }
  0x58   :  { %p2240_p11 = pnand %p2238_p10, %p2235_p9 }
  0x5a   :  { %2243 = shalt.err (!%p2240_p11)
}
  0x5b   :  { %s2244_s4 = scalar_lea.vmem %s103_s11, 16  ;;  %s2248_s10 = scalar_lea.vmem %s103_s11, 32 }
  0x5c   :  { %p2245_p12 = scmp.ne.s32.totalorder %s103_s11, %s2244_s4  ;;  %p2249_p13 = scmp.lt.s32.totalorder %s103_s11, %s103_s11 }
  0x5d   :  { %p2250_p0 = scmp.lt.s32.totalorder %s2248_s10, %s2244_s4 }
  0x5f   :  { %p2251_p1 = por %p2250_p0, %p2249_p13 }
  0x61   :  { %p2252_p2 = pnand %p2251_p1, %p2245_p12 }
  0x63   :  { %2255 = shalt.err (!%p2252_p2)
}
  0x64   :  { %105 = dma.hbm_to_vmem [thread:$0]  %s2729_s13, 16, %s103_s11, [#allocation11]  }
  0x65   :  { %2278 = dma.done.wait [#allocation5], 16  }
  0x66   :  { %2279 = vsyncadd [#allocation5], 4294967280 }
  0x67   :  { %2280 = dma.done.wait [#allocation3], 16  }
  0x68   :  { %2281 = vsyncadd [#allocation3], 4294967280 }
  0x69   :  { %2282 = dma.done.wait [#allocation8], 12288  }
  0x6a   :  { %2283 = vsyncadd [#allocation8], 4294955008 }
  0x6b   :  { %2284 = dma.done.wait [#allocation11], 48  }
  0x6c   :  { %2285 = vsyncadd [#allocation11], 4294967248 }
  0x6d   :  { %128 = sfence }
  0x6e   :  { %v232_v0 = vld [vmem:[%s2717_s1 + $0x8] sm:$0xff]  ;;  %s249_s20 = sld [smem:[#allocation2]]  ;;  %s1679_s24 = sld [smem:[#allocation2 + $0x1]]  ;;  %v231_v3 = vld [vmem:[%s2717_s1] sm:$0xff]  ;;  %v2298_v17 = vmov 0.0   ;;  %vm2299_vm0 = vmmov 0  }
  0x6f   :  { %v238_v1 = vld [vmem:[%s2718_s2 + $0x8] sm:$0xff]  ;;  %s1680_s26 = sld [smem:[#allocation2 + $0x2]]  ;;  %v237_v4 = vld [vmem:[%s2718_s2] sm:$0xff]  ;;  %v235_v7 = vunpack.c.l.bf16 %v232_v0  ;;  %v236_v8 = vunpack.c.h.bf16 %v232_v0  ;;  %s2477_s4 = sld [smem:[#allocation2 + $0x3]]  ;;  %v233_v9 = vunpack.c.l.bf16 %v231_v3  ;;  %v234_v14 = vunpack.c.h.bf16 %v231_v3  ;;  %1862 = vmatprep.subr.bf16.mxu1 %v2298_v17  ;;  %1872 = vmatprep.mubr.msk.bf16.mxu1 %vm2299_vm0, %v2298_v17  ;;  %v1928_v36 = vld [vmem:[%s2721_s5 + $0x10] sm:$0xff]  }
  0x70   :  { %v244_v2 = vld [vmem:[%s2719_s3 + $0x8] sm:$0xff]  ;;  %v243_v5 = vld [vmem:[%s2719_s3] sm:$0xff]  ;;  %v241_v10 = vunpack.c.l.bf16 %v238_v1  ;;  %v242_v11 = vunpack.c.h.bf16 %v238_v1  ;;  %v239_v15 = vunpack.c.l.bf16 %v237_v4  ;;  %v240_v19 = vunpack.c.h.bf16 %v237_v4  ;;  %s2483_s3 = sld [smem:[#allocation2 + $0x5]]  ;;  %s1684_s22 = sld [smem:[#allocation2 + $0x6]]  ;;  %v1929_v48 = vld [vmem:[%s2721_s5 + $0x18] sm:$0xff]  }
  0x71   :  { %v1926_v6 = vld [vmem:[%s2721_s5] sm:$0xff]   ;;  %v247_v12 = vunpack.c.l.bf16 %v244_v2  ;;  %v248_v13 = vunpack.c.h.bf16 %v244_v2  ;;  %v245_v16 = vunpack.c.l.bf16 %v243_v5  ;;  %v246_v20 = vunpack.c.h.bf16 %v243_v5  ;;  %v1927_v21 = vld [vmem:[%s2721_s5 + $0x8] sm:$0xff]   ;;  %s2737_s13 = sld [smem:[#allocation19_spill]]  ;;  %s2302_s27 = smov 64  }
  0x72   :  { %1863 = vmatpush3.bf16.msra.mxu1 %v1926_v6  ;;  %v2300_v45 = vmov 0   ;;  %v1930_v58 = vld [vmem:[%s2721_s5 + $0x20] sm:$0xff]   ;;  %vm184_vm1 = vcmask 654336   ;;  %v1933_v2 = vld [vmem:[%s2725_s9 + $0x8] sm:$0xff]   ;;  %v1934_v6 = vld [vmem:[%s2725_s9 + $0x10] sm:$0xff]   ;;  %s1685_s23 = sld [smem:[#allocation2 + $0x7]] }
  0x73   :  { %1864 = vmatprep.subr.bf16.mxu1 %v2298_v17  ;;  %748 = vmatprep.mubr.bf16.mxu0 %v2300_v45  ;;  %v1932_v62 = vld [vmem:[%s2725_s9] sm:$0xff]   ;;  %vm311_vm2 = vcmask 785408   ;;  %vm339_vm3 = vcmask 523264   ;;  %vm441_vm4 = vcmask 261120   ;;  %vm498_vm5 = vcmask 916480  }
  0x74   :  { %v257_v18 = vstv %s249_s20  ;;  %v262_v23 = vstv %s1679_s24  ;;  %s2301_s24 = smov 96   ;;  %s1682_s20 = sld [smem:[#allocation2 + $0x4]]  ;;  %vm1729_vm6 = vmpackc.low %vm498_vm5, %vm498_vm5 }
  0x75   :  { %v260_v22 = vmul.f32 %v257_v18, %v235_v7  ;;  %v271_v24 = vstv %s1680_s26  ;;  %v258_v25 = vmul.f32 %v257_v18, %v233_v9  ;;  %v265_v26 = vmul.f32 %v262_v23, %v241_v10  ;;  %v1935_v7 = vld [vmem:[%s2725_s9 + $0x18] sm:$0xff]   ;;  %v1937_v9 = vld [vmem:[%s2725_s9 + $0x28] sm:$0xff]   ;;  %v1938_v10 = vld [vmem:[%s2725_s9 + $0x30] sm:$0xff]  }
  0x76   :  { %v274_v27 = vmul.f32 %v271_v24, %v247_v12  ;;  %v263_v28 = vmul.f32 %v262_v23, %v239_v15  ;;  %v272_v29 = vmul.f32 %v271_v24, %v245_v16  ;;  %v261_v30 = vmul.f32 %v257_v18, %v236_v8  ;;  %1865 = vmatpush3.bf16.msra.mxu1 %v1927_v21  ;;  %v1936_v8 = vld [vmem:[%s2725_s9 + $0x20] sm:$0xff]  }
  0x77   :  { %v266_v31 = vmul.f32 %v262_v23, %v242_v11  ;;  %v269_v32 = vadd.f32 %v265_v26, %v260_v22  ;;  %v275_v33 = vmul.f32 %v271_v24, %v248_v13  ;;  %v259_v34 = vmul.f32 %v257_v18, %v234_v14  ;;  %1866 = vmatprep.subr.bf16.mxu1 %v2298_v17  ;;  %v1931_v60 = vld [vmem:[%s2737_s13] sm:$0xff]   ;;  %v1939_v11 = vld [vmem:[%s2725_s9 + $0x38] sm:$0xff]   ;;  %v1941_v13 = vld [vmem:[%s2725_s9 + $0x48] sm:$0xff]  }
  0x78   :  { %v264_v35 = vmul.f32 %v262_v23, %v240_v19  ;;  %v280_v37 = vstv %s2477_s4  ;;  %v267_v38 = vadd.f32 %v263_v28, %v258_v25  ;;  %v273_v40 = vmul.f32 %v271_v24, %v246_v20  ;;  %v1940_v12 = vld [vmem:[%s2725_s9 + $0x40] sm:$0xff]   ;;  %s2303_s9 = smov 80  }
  0x79   :  { %v270_v39 = vadd.f32 %v266_v31, %v261_v30  ;;  %v278_v41 = vadd.f32 %v274_v27, %v269_v32  ;;  %v294_v49 = vstv %s2483_s3  ;;  %v322_v0 = vstv %s1684_s22 }
  0x7a   :  { %v268_v42 = vadd.f32 %v264_v35, %v259_v34  ;;  %v276_v43 = vadd.f32 %v272_v29, %v267_v38  ;;  %1867 = vmatpush3.bf16.msra.mxu1 %v1928_v36  ;;  %v289_v15 = vstv %s1682_s20  ;;  %v350_v31 = vstv %s1685_s23 }
  0x7b   :  { %v279_v44 = vadd.f32 %v275_v33, %v270_v39  ;;  %v283_v46 = vadd.f32 %v280_v37, %v278_v41  ;;  %1868 = vmatprep.subr.bf16.mxu1 %v2298_v17 }
  0x7c   :  { %v277_v47 = vadd.f32 %v273_v40, %v268_v42  ;;  %v281_v50 = vadd.f32 %v280_v37, %v276_v43 }
  0x7d   :  { %v284_v51 = vadd.f32 %v280_v37, %v279_v44  ;;  %v2499_v52 = vmax.f32 %v283_v46, 0.0 }
  0x7e   :  { %v282_v53 = vadd.f32 %v280_v37, %v277_v47  ;;  %v2501_v54 = vmax.f32 %v281_v50, 0.0  ;;  %1869 = vmatpush3.bf16.msra.mxu1 %v1929_v48 }
  0x7f   :  { %v2503_v55 = vmax.f32 %v284_v51, 0.0  ;;  %v297_v56 = vmul.f32 %v294_v49, %v2499_v52  ;;  %1870 = vmatprep.subr.bf16.mxu1 %v2298_v17  ;;  %v325_v5 = vmul.f32 %v322_v0, %v2499_v52  ;;  %v292_v26 = vmul.f32 %v289_v15, %v2499_v52 }
  0x80   :  { %v286_v57 = vmax.f32 %v282_v53, 0.0  ;;  %v295_v59 = vmul.f32 %v294_v49, %v2501_v54  ;;  %v323_v3 = vmul.f32 %v322_v0, %v2501_v54  ;;  %v290_v21 = vmul.f32 %v289_v15, %v2501_v54 }
  0x81   :  { %307 = vrot.lane.b32.xlu1 %v297_v56, %s2301_s24  ;;  %v298_v61 = vmul.f32 %v294_v49, %v2503_v55  ;;  %v326_v4 = vmul.f32 %v322_v0, %v2503_v55  ;;  %v293_v23 = vmul.f32 %v289_v15, %v2503_v55  ;;  %v1942_v56 = vld [vmem:[#allocation7 + $0x4] ss:$16 sps:$4 sm:$0xff]  }
  0x82   :  { %303 = vrot.lane.b32.xlu0 %v295_v59, %s2301_s24  ;;  %v296_v63 = vmul.f32 %v294_v49, %v286_v57  ;;  %1871 = vmatpush3.bf16.msra.mxu1 %v1930_v58  ;;  %v324_v1 = vmul.f32 %v322_v0, %v286_v57  ;;  %v291_v18 = vmul.f32 %v289_v15, %v286_v57  ;;  %v1944_v57 = vld [vmem:[#allocation7 + $0x8] ss:$16 sps:$4 sm:$0xff]   ;;  %v1946_v58 = vld [vmem:[#allocation7 + $0xc] ss:$16 sps:$4 sm:$0xff]   ;;  %v1947_v59 = vld [vmem:[#allocation7] ss:$16 sps:$4 sm:$0xff]  }
  0x83   :  { %445 = vmatprep.subr.bf16.mxu1 %v2300_v45  ;;  %716 = vmatprep.subr.bf16.mxu0 %v1942_v56  ;;  %v1958_v0 = vld [vmem:[#allocation7 + $0x4c] ss:$16 sps:$4 sm:$0xff]   ;;  %v1978_v15 = vld [vmem:[#allocation7 + $0xc4] ss:$16 sps:$4 sm:$0xff]   ;;  %v2008_v56 = vld [vmem:[#allocation9 + $0x60] ss:$8 sps:$4 sm:$0xff]  }
  0x84   :  { %717 = vmatpush1.bf16.msra.mxu0 %v1947_v59  ;;  %v2016_v59 = vld [vmem:[#allocation9 + $0x84] ss:$8 sps:$4 sm:$0xff]  }
  0x85   :  { %309 = vrot.lane.b32.xlu1 %v298_v61, %s2301_s24  ;;  %1873 = vmatmul.mubr.msk.bf16.vlgmr.msra.gmra.mrb[0].mxu1 %vm184_vm1, %v1931_v60  ;;  %v1948_v60 = vld [vmem:[#allocation7 + $0x24] ss:$16 sps:$4 sm:$0xff]   ;;  %v1952_v61 = vld [vmem:[#allocation7 + $0x2c] ss:$16 sps:$4 sm:$0xff]  }
  0x86   :  { %305 = vrot.lane.b32.xlu0 %v296_v63, %s2301_s24  ;;  %446 = vmatpush1.bf16.msra.mxu1 %v1932_v62  ;;  %v1950_v62 = vld [vmem:[#allocation7 + $0x28] ss:$16 sps:$4 sm:$0xff]   ;;  %v1953_v63 = vld [vmem:[#allocation7 + $0x20] ss:$16 sps:$4 sm:$0xff]  }
  0x87   :  { %447 = vmatprep.subr.bf16.mxu1 %v2300_v45  ;;  %718 = vmatprep.subr.bf16.mxu0 %v1948_v60  ;;  %v2014_v60 = vld [vmem:[#allocation9 + $0x80] ss:$8 sps:$4 sm:$0xff]  }
  0x88   :  { %719 = vmatpush1.bf16.msra.mxu0 %v1953_v63  ;;  %v2022_v63 = vld [vmem:[#allocation9 + $0xa4] ss:$8 sps:$4 sm:$0xff]  }
  0x89   :  { %333 = vrot.lane.b32.xlu1 %v324_v1, %s2302_s27  ;;  %v1956_v1 = vld [vmem:[#allocation7 + $0x48] ss:$16 sps:$4 sm:$0xff]  }
  0x8a   :  { %331 = vrot.lane.b32.xlu0 %v323_v3, %s2302_s27  ;;  %448 = vmatpush1.bf16.msra.mxu1 %v1933_v2  ;;  %v1959_v2 = vld [vmem:[#allocation7 + $0x40] ss:$16 sps:$4 sm:$0xff]   ;;  %v1960_v3 = vld [vmem:[#allocation7 + $0x64] ss:$16 sps:$4 sm:$0xff]  }
  0x8b   :  { %449 = vmatprep.subr.bf16.mxu1 %v2300_v45 }
  0x8d   :  { %337 = vrot.lane.b32.xlu1 %v326_v4, %s2302_s27  ;;  %v1964_v4 = vld [vmem:[#allocation7 + $0x6c] ss:$16 sps:$4 sm:$0xff]  }
  0x8e   :  { %335 = vrot.lane.b32.xlu0 %v325_v5, %s2302_s27  ;;  %450 = vmatpush1.bf16.msra.mxu1 %v1934_v6  ;;  %v1962_v5 = vld [vmem:[#allocation7 + $0x68] ss:$16 sps:$4 sm:$0xff]   ;;  %v1965_v6 = vld [vmem:[#allocation7 + $0x60] ss:$16 sps:$4 sm:$0xff]  }
  0x8f   :  { %451 = vmatprep.subr.bf16.mxu1 %v2300_v45 }
  0x92   :  { %452 = vmatpush1.bf16.msra.mxu1 %v1935_v7  ;;  %v1966_v7 = vld [vmem:[#allocation7 + $0x84] ss:$16 sps:$4 sm:$0xff]  }
  0x93   :  { %453 = vmatprep.subr.bf16.mxu1 %v2300_v45 }
  0x96   :  { %454 = vmatpush1.bf16.msra.mxu1 %v1936_v8  ;;  %v1970_v8 = vld [vmem:[#allocation7 + $0x8c] ss:$16 sps:$4 sm:$0xff]  }
  0x97   :  { %455 = vmatprep.subr.bf16.mxu1 %v2300_v45 }
  0x9a   :  { %456 = vmatpush1.bf16.msra.mxu1 %v1937_v9  ;;  %v1968_v9 = vld [vmem:[#allocation7 + $0x88] ss:$16 sps:$4 sm:$0xff]  }
  0x9b   :  { %457 = vmatprep.subr.bf16.mxu1 %v2300_v45 }
  0x9e   :  { %458 = vmatpush1.bf16.msra.mxu1 %v1938_v10  ;;  %v1971_v10 = vld [vmem:[#allocation7 + $0x80] ss:$16 sps:$4 sm:$0xff]  }
  0x9f   :  { %459 = vmatprep.subr.bf16.mxu1 %v2300_v45 }
  0xa2   :  { %460 = vmatpush1.bf16.msra.mxu1 %v1939_v11  ;;  %v1972_v11 = vld [vmem:[#allocation7 + $0xa4] ss:$16 sps:$4 sm:$0xff]  }
  0xa3   :  { %461 = vmatprep.subr.bf16.mxu1 %v2300_v45 }
  0xa6   :  { %462 = vmatpush1.bf16.msra.mxu1 %v1940_v12  ;;  %v1976_v12 = vld [vmem:[#allocation7 + $0xac] ss:$16 sps:$4 sm:$0xff]  }
  0xa7   :  { %463 = vmatprep.subr.bf16.mxu1 %v2300_v45 }
  0xaa   :  { %464 = vmatpush1.bf16.msra.mxu1 %v1941_v13  ;;  %v1974_v13 = vld [vmem:[#allocation7 + $0xa8] ss:$16 sps:$4 sm:$0xff]  }
  0xab   :  { %759 = vmatprep.subr.bf16.mxu1 %v1946_v58  ;;  %v2011_v58 = vld [vmem:[#allocation9 + $0x70] ss:$8 sps:$4 sm:$0xff]  }
  0xf3   :  { %v308_v14 = vpop.permute.xlu1 %307 }
  0xf4   :  { %v304_v16 = vpop.permute.xlu0 %303 }
  0xf7   :  { %v310_v19 = vpop.permute.xlu1 %309 }
  0xf8   :  { %v306_v20 = vpop.permute.xlu0 %305  ;;  %v313_v30 = vsel %vm311_vm2, %v308_v14, %v310_v19  ;;  %v321_v33 = vadd.f32 %v310_v19, %v293_v23  ;;  %v1977_v14 = vld [vmem:[#allocation7 + $0xa0] ss:$16 sps:$4 sm:$0xff]  }
  0xf9   :  { %v312_v22 = vsel %vm311_vm2, %v304_v16, %v306_v20  ;;  %v319_v24 = vadd.f32 %v306_v20, %v291_v18  ;;  %v320_v36 = vadd.f32 %v313_v30, %v292_v26  ;;  %v1982_v16 = vld [vmem:[#allocation7 + $0xcc] ss:$16 sps:$4 sm:$0xff]   ;;  %v1980_v18 = vld [vmem:[#allocation7 + $0xc8] ss:$16 sps:$4 sm:$0xff]   ;;  %v1983_v19 = vld [vmem:[#allocation7 + $0xc0] ss:$16 sps:$4 sm:$0xff]  }
  0xfa   :  { %v318_v27 = vadd.f32 %v312_v22, %v290_v21  ;;  %v1984_v20 = vld [vmem:[#allocation7 + $0xe4] ss:$16 sps:$4 sm:$0xff]   ;;  %v1988_v21 = vld [vmem:[#allocation7 + $0xec] ss:$16 sps:$4 sm:$0xff]   ;;  %v1986_v22 = vld [vmem:[#allocation7 + $0xe8] ss:$16 sps:$4 sm:$0xff]  }
  0xfb   :  { %v334_v25 = vpop.permute.xlu1 %333  ;;  %v1989_v23 = vld [vmem:[#allocation7 + $0xe0] ss:$16 sps:$4 sm:$0xff]  }
  0xfc   :  { %v347_v28 = vadd.f32 %v334_v25, %v319_v24  ;;  %v332_v29 = vpop.permute.xlu0 %331  ;;  %v1992_v24 = vld [vmem:[#allocation9 + $0x4] ss:$8 sps:$4 sm:$0xff]  }
  0xfd   :  { %v340_v32 = vsel %vm339_vm3, %v332_v29, %v334_v25 }
  0xfe   :  { %v346_v34 = vadd.f32 %v340_v32, %v318_v27  ;;  %v352_v37 = vadd.f32 %v350_v31, %v347_v28  ;;  %v1671_v32 = vld [vmem:[#allocation6] ss:$0 sm:$0xff] }
  0xff   :  { %v338_v35 = vpop.permute.xlu1 %337 }
 0x100   :  { %v349_v38 = vadd.f32 %v338_v35, %v321_v33  ;;  %v336_v39 = vpop.permute.xlu0 %335  ;;  %v351_v41 = vadd.f32 %v350_v31, %v346_v34  ;;  %v356_v44 = vmax.f32 %v352_v37, 0.0 }
 0x101   :  { %v341_v40 = vsel %vm339_vm3, %v336_v39, %v338_v35 }
 0x102   :  { %v354_v42 = vadd.f32 %v350_v31, %v349_v38  ;;  %v348_v43 = vadd.f32 %v341_v40, %v320_v36  ;;  %v355_v48 = vmax.f32 %v351_v41, 0.0 }
 0x104   :  { %v358_v46 = vmax.f32 %v354_v42, 0.0  ;;  %v353_v47 = vadd.f32 %v350_v31, %v348_v43  ;;  %v1990_v42 = vld [vmem:[#allocation9] ss:$8 sps:$4 sm:$0xff]  }
 0x106   :  { %v360_v49 = vpack.c.bf16 %v358_v46, %v356_v44  ;;  %v357_v50 = vmax.f32 %v353_v47, 0.0  ;;  %v1995_v44 = vld [vmem:[#allocation9 + $0x14] ss:$8 sps:$4 sm:$0xff]   ;;  %v1993_v46 = vld [vmem:[#allocation9 + $0x10] ss:$8 sps:$4 sm:$0xff]  }
 0x107   :  { %v1998_v47 = vld [vmem:[#allocation9 + $0x24] ss:$8 sps:$4 sm:$0xff]  }
 0x108   :  { %v359_v51 = vpack.c.bf16 %v357_v50, %v355_v48  ;;  %1696 = vmatprep.mubr.msk.bf16.mxu1 %vm441_vm4, %v360_v49  ;;  %v1996_v48 = vld [vmem:[#allocation9 + $0x20] ss:$8 sps:$4 sm:$0xff]   ;;  %v2001_v49 = vld [vmem:[#allocation9 + $0x34] ss:$8 sps:$4 sm:$0xff]   ;;  %v1999_v50 = vld [vmem:[#allocation9 + $0x30] ss:$8 sps:$4 sm:$0xff]  }
 0x10a   :  { %478 = vmatmul.mubr.bf16.vlgmr.msra.gmra.mrb[4].mxu1 %v359_v51  ;;  %v2004_v51 = vld [vmem:[#allocation9 + $0x44] ss:$8 sps:$4 sm:$0xff]  }
 0x10b   :  { %791 = vmatprep.mubr.bf16.mxu1 %v2300_v45  ;;  %760 = vmatpush1.bf16.msra.mxu1 %v1944_v57  ;;  %v1954_v45 = vld [vmem:[#allocation7 + $0x44] ss:$16 sps:$4 sm:$0xff]  }
 0x10c   :  { %761 = vmatprep.subr.bf16.mxu1 %v1952_v61  ;;  %720 = vmatprep.subr.bf16.mxu0 %v1954_v45  ;;  %v2013_v57 = vld [vmem:[#allocation9 + $0x74] ss:$8 sps:$4 sm:$0xff]   ;;  %v2020_v45 = vld [vmem:[#allocation9 + $0xa0] ss:$8 sps:$4 sm:$0xff]  }
 0x10d   :  { %721 = vmatpush1.bf16.msra.mxu0 %v1959_v2  ;;  %v2019_v61 = vld [vmem:[#allocation9 + $0x94] ss:$8 sps:$4 sm:$0xff]   ;;  %v2028_v2 = vld [vmem:[#allocation9 + $0xc4] ss:$8 sps:$4 sm:$0xff]  }
 0x10e   :  { %722 = vmatprep.subr.bf16.mxu0 %v1960_v3  ;;  %v2026_v3 = vld [vmem:[#allocation9 + $0xc0] ss:$8 sps:$4 sm:$0xff]  }
 0x10f   :  { %762 = vmatpush1.bf16.msra.mxu1 %v1950_v62  ;;  %v2017_v62 = vld [vmem:[#allocation9 + $0x90] ss:$8 sps:$4 sm:$0xff]  }
 0x110   :  { %763 = vmatprep.subr.bf16.mxu1 %v1958_v0  ;;  %v2025_v0 = vld [vmem:[#allocation9 + $0xb4] ss:$8 sps:$4 sm:$0xff]  }
 0x111   :  { %723 = vmatpush1.bf16.msra.mxu0 %v1965_v6  ;;  %v2034_v6 = vld [vmem:[#allocation9 + $0xe4] ss:$8 sps:$4 sm:$0xff]  }
 0x112   :  { %724 = vmatprep.subr.bf16.mxu0 %v1966_v7  ;;  %v2032_v7 = vld [vmem:[#allocation9 + $0xe0] ss:$8 sps:$4 sm:$0xff]  }
 0x113   :  { %764 = vmatpush1.bf16.msra.mxu1 %v1956_v1  ;;  %v2023_v1 = vld [vmem:[#allocation9 + $0xb0] ss:$8 sps:$4 sm:$0xff]  }
 0x114   :  { %765 = vmatprep.subr.bf16.mxu1 %v1964_v4  ;;  %v2031_v4 = vld [vmem:[#allocation9 + $0xd4] ss:$8 sps:$4 sm:$0xff]  }
 0x115   :  { %725 = vmatpush1.bf16.msra.mxu0 %v1971_v10  ;;  %v2040_v10 = vld [vmem:[#allocation9 + $0x104] ss:$8 sps:$4 sm:$0xff]  }
 0x116   :  { %726 = vmatprep.subr.bf16.mxu0 %v1972_v11  ;;  %v2086_v11 = vld [vmem:[%s2728_s12 + $0x40] sm:$0xff]  }
 0x117   :  { %766 = vmatpush1.bf16.msra.mxu1 %v1962_v5  ;;  %v2029_v5 = vld [vmem:[#allocation9 + $0xd0] ss:$8 sps:$4 sm:$0xff]  }
 0x118   :  { %767 = vmatprep.subr.bf16.mxu1 %v1970_v8  ;;  %v2037_v8 = vld [vmem:[#allocation9 + $0xf4] ss:$8 sps:$4 sm:$0xff]  }
 0x119   :  { %727 = vmatpush1.bf16.msra.mxu0 %v1977_v14  ;;  %v2089_v14 = vld [vmem:[%s2728_s12 + $0x8] sm:$0xff]  }
 0x11a   :  { %728 = vmatprep.subr.bf16.mxu0 %v1978_v15  ;;  %v2090_v15 = vld [vmem:[%s2728_s12 + $0x50] sm:$0xff]  }
 0x11b   :  { %768 = vmatpush1.bf16.msra.mxu1 %v1968_v9  ;;  %v2035_v9 = vld [vmem:[#allocation9 + $0xf0] ss:$8 sps:$4 sm:$0xff]  }
 0x11c   :  { %769 = vmatprep.subr.bf16.mxu1 %v1976_v12  ;;  %v2087_v12 = vld [vmem:[%s2728_s12] sm:$0xff]  }
 0x11d   :  { %729 = vmatpush1.bf16.msra.mxu0 %v1983_v19  ;;  %v2093_v19 = vld [vmem:[%s2728_s12 + $0x18] sm:$0xff]  }
 0x11e   :  { %730 = vmatprep.subr.bf16.mxu0 %v1984_v20  ;;  %v2094_v20 = vld [vmem:[%s2728_s12 + $0x60] sm:$0xff]  }
 0x11f   :  { %770 = vmatpush1.bf16.msra.mxu1 %v1974_v13  ;;  %v2088_v13 = vld [vmem:[%s2728_s12 + $0x48] sm:$0xff]  }
 0x120   :  { %771 = vmatprep.subr.bf16.mxu1 %v1982_v16  ;;  %v2091_v16 = vld [vmem:[%s2728_s12 + $0x10] sm:$0xff]  }
 0x121   :  { %731 = vmatpush1.bf16.msra.mxu0 %v1989_v23  ;;  %v536_v23 = vlaneseq }
 0x122   :  { %1210 = vmatprep.subr.bf16.mxu0 %v1992_v24 }
 0x123   :  { %772 = vmatpush1.bf16.msra.mxu1 %v1980_v18  ;;  %v2092_v18 = vld [vmem:[%s2728_s12 + $0x58] sm:$0xff]   ;;  %v2611_v24 = vshrl.u32 %v536_v23, 7  ;;  %v2074_v23 = vld [vmem:[#allocation9 + $0x1c0] ss:$8 sps:$4 sm:$0xff]  }
 0x124   :  { %773 = vmatprep.subr.bf16.mxu1 %v1988_v21  ;;  %v2095_v21 = vld [vmem:[%s2728_s12 + $0x20] sm:$0xff]  }
 0x127   :  { %774 = vmatpush1.bf16.msra.mxu1 %v1986_v22  ;;  %v2096_v22 = vld [vmem:[%s2728_s12 + $0x68] sm:$0xff]  }
 0x128   :  { %1831 = vmatprep.subr.bf16.mxu1 %v2086_v11  ;;  %v2061_v11 = vld [vmem:[#allocation9 + $0x174] ss:$8 sps:$4 sm:$0xff]  }
 0x158   :  { %v2570_v52 = vpop.f32.mrb[0].mxu1 }
 0x159   :  { %v1874_v53 = vpop.f32.mrb[1].mxu1  ;;  %v223_v33 = vadd.f32 %v1671_v32, %v2570_v52  ;;  %v2002_v52 = vld [vmem:[#allocation9 + $0x40] ss:$8 sps:$4 sm:$0xff]  }
 0x15a   :  { %v2572_v54 = vpop.f32.mrb[2].mxu1  ;;  %v2007_v53 = vld [vmem:[#allocation9 + $0x54] ss:$8 sps:$4 sm:$0xff]  }
 0x15b   :  { %v1875_v55 = vpop.f32.mrb[3].mxu1  ;;  %v226_v34 = vadd.f32 %v1671_v32, %v2572_v54  ;;  %v229_v36 = vmax.f32 %v223_v33, 0.0  ;;  %v2005_v54 = vld [vmem:[#allocation9 + $0x50] ss:$8 sps:$4 sm:$0xff]  }
 0x15c   :  { %v2010_v55 = vld [vmem:[#allocation9 + $0x64] ss:$8 sps:$4 sm:$0xff]  }
 0x15d   :  { %v230_v37 = vmax.f32 %v226_v34, 0.0 }
 0x1dd   :  { %v479_v25 = vpop.f32.mrb[4].mxu1 }
 0x1de   :  { %v481_v26 = vpop.f32.mrb[5].mxu1  ;;  %v486_v28 = vmax.f32 %v479_v25, 0.0  ;;  %v538_v25 = vsub.s32 0, %v2611_v24 }
 0x1df   :  { %v482_v27 = vpop.f32.mrb[6].mxu1  ;;  %v546_v26 = vsub.s32 2, %v2611_v24 }
 0x1e0   :  { %v487_v29 = vmax.f32 %v482_v27, 0.0  ;;  %v484_v30 = vpop.f32.mrb[7].mxu1  ;;  %v534_v27 = vld [vmem:[%s2724_s8] sm:$0xf] }
 0x1e1   :  { %v539_v30 = vrot.slane %v534_v27, %v538_v25 }
 0x1e2   :  { %v1921_v31 = vpack.i.bf16 %v487_v29, %v486_v28  ;;  %v542_v28 = vsub.s32 1, %v2611_v24  ;;  %v550_v29 = vsub.s32 3, %v2611_v24  ;;  %v2103_v24 = vld [vmem:[%s2730_s14 + $0x8] sm:$0xff]  }
 0x1e4   :  { %1922 = vrot.lane.b32.xlu0 %v1921_v31, %s2303_s9  ;;  %v547_v31 = vrot.slane %v534_v27, %v546_v26  ;;  %v543_v32 = vrot.slane %v534_v27, %v542_v28  ;;  %v551_v33 = vrot.slane %v534_v27, %v550_v29  ;;  %v2079_v26 = vld [vmem:[#allocation9 + $0x1d4] ss:$8 sps:$4 sm:$0xff]   ;;  %v2077_v27 = vld [vmem:[#allocation9 + $0x1d0] ss:$8 sps:$4 sm:$0xff]   ;;  %v2082_v29 = vld [vmem:[#allocation9 + $0x1e4] ss:$8 sps:$4 sm:$0xff]  }
 0x1e5   :  { %s2738_s9 = sld [smem:[#allocation20_spill]] }
 0x256   :  { %v1923_v35 = vpop.permute.xlu0 %1922 }
 0x257   :  { %v1925_v38 = vunpack.i.h.bf16 %v1923_v35  ;;  %v1924_v39 = vunpack.i.l.bf16 %v1923_v35 }
 0x259   :  { %v497_v40 = vsel %vm184_vm1, %v230_v37, %v1925_v38  ;;  %v496_v41 = vsel %vm184_vm1, %v229_v36, %v1924_v39 }
 0x25a   :  { %v1730_v43 = vpack.c.bf16 %v497_v40, %v496_v41 }
 0x25c   :  { %1731 = vmatmul.mubr.msk.bf16.vlgmr.msra.gmra.mrb[0].mxu0 %vm1729_vm6, %v1730_v43  ;;  %1734 = vmatmul.mubr.msk.bf16.vlgmr.msra.gmra.mrb[8].mxu1 %vm1729_vm6, %v1730_v43 }
 0x25d   :  { %1211 = vmatpush1.bf16.msra.mxu0 %v1990_v42  ;;  %1832 = vmatpush3.bf16.msra.mxu1 %v2087_v12  ;;  %v2059_v12 = vld [vmem:[#allocation9 + $0x170] ss:$8 sps:$4 sm:$0xff]  }
 0x25e   :  { %1212 = vmatprep.subr.bf16.mxu0 %v1995_v44  ;;  %1833 = vmatprep.subr.bf16.mxu1 %v2088_v13  ;;  %v2064_v13 = vld [vmem:[#allocation9 + $0x184] ss:$8 sps:$4 sm:$0xff]  }
 0x261   :  { %1213 = vmatpush1.bf16.msra.mxu0 %v1993_v46  ;;  %1834 = vmatpush3.bf16.msra.mxu1 %v2089_v14  ;;  %v2062_v14 = vld [vmem:[#allocation9 + $0x180] ss:$8 sps:$4 sm:$0xff]  }
 0x262   :  { %1214 = vmatprep.subr.bf16.mxu0 %v1998_v47  ;;  %1835 = vmatprep.subr.bf16.mxu1 %v2090_v15  ;;  %v2067_v15 = vld [vmem:[#allocation9 + $0x194] ss:$8 sps:$4 sm:$0xff]  }
 0x265   :  { %1215 = vmatpush1.bf16.msra.mxu0 %v1996_v48  ;;  %1836 = vmatpush3.bf16.msra.mxu1 %v2091_v16  ;;  %v2065_v16 = vld [vmem:[#allocation9 + $0x190] ss:$8 sps:$4 sm:$0xff]  }
 0x266   :  { %1216 = vmatprep.subr.bf16.mxu0 %v2001_v49  ;;  %1837 = vmatprep.subr.bf16.mxu1 %v2092_v18  ;;  %v2070_v18 = vld [vmem:[#allocation9 + $0x1a4] ss:$8 sps:$4 sm:$0xff]  }
 0x269   :  { %1217 = vmatpush1.bf16.msra.mxu0 %v1999_v50  ;;  %1838 = vmatpush3.bf16.msra.mxu1 %v2093_v19  ;;  %v2068_v19 = vld [vmem:[#allocation9 + $0x1a0] ss:$8 sps:$4 sm:$0xff]  }
 0x26a   :  { %1218 = vmatprep.subr.bf16.mxu0 %v2004_v51  ;;  %1839 = vmatprep.subr.bf16.mxu1 %v2094_v20  ;;  %v2073_v20 = vld [vmem:[#allocation9 + $0x1b4] ss:$8 sps:$4 sm:$0xff]  }
 0x26d   :  { %1219 = vmatpush1.bf16.msra.mxu0 %v2002_v52  ;;  %1840 = vmatpush3.bf16.msra.mxu1 %v2095_v21  ;;  %v2071_v21 = vld [vmem:[#allocation9 + $0x1b0] ss:$8 sps:$4 sm:$0xff]  }
 0x26e   :  { %1220 = vmatprep.subr.bf16.mxu0 %v2007_v53  ;;  %1841 = vmatprep.subr.bf16.mxu1 %v2096_v22  ;;  %v2076_v22 = vld [vmem:[#allocation9 + $0x1c4] ss:$8 sps:$4 sm:$0xff]  }
 0x271   :  { %1221 = vmatpush1.bf16.msra.mxu0 %v2005_v54 }
 0x272   :  { %1222 = vmatprep.subr.bf16.mxu0 %v2010_v55 }
 0x275   :  { %1223 = vmatpush1.bf16.msra.mxu0 %v2008_v56 }
 0x276   :  { %1224 = vmatprep.subr.bf16.mxu0 %v2013_v57 }
 0x279   :  { %1225 = vmatpush1.bf16.msra.mxu0 %v2011_v58 }
 0x27a   :  { %1226 = vmatprep.subr.bf16.mxu0 %v2016_v59 }
 0x27d   :  { %1227 = vmatpush1.bf16.msra.mxu0 %v2014_v60 }
 0x27e   :  { %1228 = vmatprep.subr.bf16.mxu0 %v2019_v61 }
 0x281   :  { %1229 = vmatpush1.bf16.msra.mxu0 %v2017_v62  ;;  %v2038_v62 = vld [vmem:[#allocation9 + $0x100] ss:$8 sps:$4 sm:$0xff]  }
 0x282   :  { %1230 = vmatprep.subr.bf16.mxu0 %v2022_v63 }
 0x285   :  { %1231 = vmatpush1.bf16.msra.mxu0 %v2020_v45  ;;  %v2043_v45 = vld [vmem:[#allocation9 + $0x114] ss:$8 sps:$4 sm:$0xff]  }
 0x286   :  { %1232 = vmatprep.subr.bf16.mxu0 %v2025_v0  ;;  %v2041_v0 = vld [vmem:[#allocation9 + $0x110] ss:$8 sps:$4 sm:$0xff]  }
 0x289   :  { %1233 = vmatpush1.bf16.msra.mxu0 %v2023_v1  ;;  %v2046_v1 = vld [vmem:[#allocation9 + $0x124] ss:$8 sps:$4 sm:$0xff]  }
 0x28a   :  { %1234 = vmatprep.subr.bf16.mxu0 %v2028_v2  ;;  %v2044_v2 = vld [vmem:[#allocation9 + $0x120] ss:$8 sps:$4 sm:$0xff]  }
 0x28d   :  { %1235 = vmatpush1.bf16.msra.mxu0 %v2026_v3  ;;  %v2049_v3 = vld [vmem:[#allocation9 + $0x134] ss:$8 sps:$4 sm:$0xff]  }
 0x28e   :  { %1236 = vmatprep.subr.bf16.mxu0 %v2031_v4  ;;  %v2047_v4 = vld [vmem:[#allocation9 + $0x130] ss:$8 sps:$4 sm:$0xff]  }
 0x291   :  { %1237 = vmatpush1.bf16.msra.mxu0 %v2029_v5  ;;  %v2052_v5 = vld [vmem:[#allocation9 + $0x144] ss:$8 sps:$4 sm:$0xff]  }
 0x292   :  { %1238 = vmatprep.subr.bf16.mxu0 %v2034_v6  ;;  %v2050_v6 = vld [vmem:[#allocation9 + $0x140] ss:$8 sps:$4 sm:$0xff]  }
 0x295   :  { %1239 = vmatpush1.bf16.msra.mxu0 %v2032_v7  ;;  %v2055_v7 = vld [vmem:[#allocation9 + $0x154] ss:$8 sps:$4 sm:$0xff]  }
 0x296   :  { %1240 = vmatprep.subr.bf16.mxu0 %v2037_v8  ;;  %v2053_v8 = vld [vmem:[#allocation9 + $0x150] ss:$8 sps:$4 sm:$0xff]  }
 0x299   :  { %1241 = vmatpush1.bf16.msra.mxu0 %v2035_v9  ;;  %v2058_v9 = vld [vmem:[#allocation9 + $0x164] ss:$8 sps:$4 sm:$0xff]  }
 0x29a   :  { %1253 = vmatprep.subr.bf16.mxu0 %v2040_v10  ;;  %v2056_v10 = vld [vmem:[#allocation9 + $0x160] ss:$8 sps:$4 sm:$0xff]  }
 0x32f   :  { %v750_v34 = vpop.f32.mrb[0].mxu0  ;;  %v793_v35 = vpop.f32.mrb[8].mxu1 }
 0x330   :  { %v751_v36 = vadd.f32 %v750_v34, %v539_v30  ;;  %v794_v37 = vadd.f32 %v793_v35, %v547_v31  ;;  %v752_v38 = vpop.f32.mrb[1].mxu0  ;;  %v795_v39 = vpop.f32.mrb[9].mxu1  ;;  %v2098_v34 = vld [vmem:[%s2728_s12 + $0x70] sm:$0xff]  }
 0x331   :  { %v753_v40 = vadd.f32 %v752_v38, %v543_v32  ;;  %v796_v41 = vadd.f32 %v795_v39, %v551_v33  ;;  %v754_v42 = vpop.f32.mrb[2].mxu0  ;;  %v797_v43 = vpop.f32.mrb[10].mxu1  ;;  %v2099_v35 = vld [vmem:[%s2728_s12 + $0x30] sm:$0xff]   ;;  %v878_v38 = vld [vmem:[#allocation10] sm:$0x3] }
 0x332   :  { %2110 = vtanh.f32 %v751_v36  ;;  %v755_v44 = vadd.f32 %v754_v42, %v539_v30  ;;  %v756_v46 = vpop.f32.mrb[3].mxu0  ;;  %v799_v47 = vpop.f32.mrb[11].mxu1  ;;  %v798_v48 = vadd.f32 %v797_v43, %v547_v31  ;;  %v2080_v30 = vld [vmem:[#allocation9 + $0x1e0] ss:$8 sps:$4 sm:$0xff]   ;;  %v2085_v31 = vld [vmem:[#allocation9 + $0x1f4] ss:$8 sps:$4 sm:$0xff]   ;;  %v883_v39 = vrot.slane %v878_v38, %v538_v25 }
 0x333   :  { %2112 = vtanh.f32 %v794_v37  ;;  %v757_v49 = vadd.f32 %v756_v46, %v543_v32  ;;  %v800_v50 = vadd.f32 %v799_v47, %v551_v33  ;;  %v2083_v32 = vld [vmem:[#allocation9 + $0x1f0] ss:$8 sps:$4 sm:$0xff]   ;;  %v2097_v33 = vld [vmem:[%s2728_s12 + $0x28] sm:$0xff]   ;;  %v2102_v25 = vld [vmem:[%s2730_s14] sm:$0xff]  }
 0x334   :  { %2114 = vtanh.f32 %v753_v40  ;;  %1842 = vmatpush3.bf16.msra.mxu1 %v2097_v33  ;;  %v2100_v36 = vld [vmem:[%s2728_s12 + $0x78] sm:$0xff]   ;;  %v887_v40 = vrot.slane %v878_v38, %v542_v28  ;;  %v2104_v28 = vld [vmem:[%s2730_s14 + $0x10] sm:$0xff]  }
 0x335   :  { %2116 = vtanh.f32 %v796_v41  ;;  %1843 = vmatprep.subr.bf16.mxu1 %v2098_v34  ;;  %v2101_v37 = vld [vmem:[%s2728_s12 + $0x38] sm:$0xff]  }
 0x336   :  { %2118 = vtanh.f32 %v755_v44 }
 0x337   :  { %2120 = vtanh.f32 %v798_v48 }
 0x338   :  { %2122 = vtanh.f32 %v757_v49  ;;  %1844 = vmatpush3.bf16.msra.mxu1 %v2099_v35 }
 0x339   :  { %2124 = vtanh.f32 %v800_v50  ;;  %1845 = vmatprep.subr.bf16.mxu1 %v2100_v36 }
 0x33c   :  { %v2111_v51 = vpop.eup %2110  ;;  %1846 = vmatpush3.bf16.msra.mxu1 %v2101_v37 }
 0x33d   :  { %v2624_v52 = vpop.eup %2112  ;;  %1876 = vmatprep.subr.bf16.mxu1 %v2298_v17 }
 0x33e   :  { %v2115_v53 = vpop.eup %2114 }
 0x33f   :  { %v2117_v54 = vpop.eup %2116 }
 0x340   :  { %v2119_v55 = vpop.eup %2118 }
 0x341   :  { %v2626_v56 = vpop.eup %2120  ;;  %v810_v57 = vpack.c.bf16 %v2119_v55, %v2111_v51 }
 0x342   :  { %v2123_v58 = vpop.eup %2122  ;;  %v812_v59 = vpack.c.bf16 %v2626_v56, %v2624_v52  ;;  %v2105_v56 = vld [vmem:[%s2730_s14 + $0x18] sm:$0xff]  }
 0x343   :  { %v2125_v60 = vpop.eup %2124  ;;  %v811_v61 = vpack.c.bf16 %v2123_v58, %v2115_v53  ;;  %v2107_v58 = vld [vmem:[%s2730_s14 + $0x28] sm:$0xff]  }
 0x344   :  { %v813_v63 = vpack.c.bf16 %v2125_v60, %v2117_v54  ;;  %v2109_v60 = vld [vmem:[%s2730_s14 + $0x38] sm:$0xff]  }
 0x345   :  { %1242 = vmatprep.mubr.bf16.mxu0 %v811_v61 }
 0x346   :  { %1243 = vmatmul.mubr.bf16.vlgmr.msra.gmra.mrb[4].mxu0 %v810_v57  ;;  %v2106_v57 = vld [vmem:[%s2730_s14 + $0x20] sm:$0xff]  }
 0x347   :  { %1254 = vmatpush1.bf16.msra.mxu0 %v2038_v62  ;;  %1285 = vmatprep.mubr.bf16.mxu0 %v813_v63  ;;  %v1799_v62 = vld [vmem:[#allocation12] ss:$0 sm:$0xff] }
 0x348   :  { %1255 = vmatprep.subr.bf16.mxu0 %v2043_v45 }
 0x34b   :  { %1256 = vmatpush1.bf16.msra.mxu0 %v2041_v0 }
 0x34c   :  { %1257 = vmatprep.subr.bf16.mxu0 %v2046_v1 }
 0x34f   :  { %1258 = vmatpush1.bf16.msra.mxu0 %v2044_v2 }
 0x350   :  { %1259 = vmatprep.subr.bf16.mxu0 %v2049_v3 }
 0x353   :  { %1260 = vmatpush1.bf16.msra.mxu0 %v2047_v4 }
 0x354   :  { %1261 = vmatprep.subr.bf16.mxu0 %v2052_v5 }
 0x357   :  { %1262 = vmatpush1.bf16.msra.mxu0 %v2050_v6 }
 0x358   :  { %1263 = vmatprep.subr.bf16.mxu0 %v2055_v7 }
 0x35b   :  { %1264 = vmatpush1.bf16.msra.mxu0 %v2053_v8 }
 0x35c   :  { %1265 = vmatprep.subr.bf16.mxu0 %v2058_v9 }
 0x35f   :  { %1266 = vmatpush1.bf16.msra.mxu0 %v2056_v10 }
 0x360   :  { %1267 = vmatprep.subr.bf16.mxu0 %v2061_v11 }
 0x363   :  { %1268 = vmatpush1.bf16.msra.mxu0 %v2059_v12 }
 0x364   :  { %1269 = vmatprep.subr.bf16.mxu0 %v2064_v13 }
 0x367   :  { %1270 = vmatpush1.bf16.msra.mxu0 %v2062_v14 }
 0x368   :  { %1271 = vmatprep.subr.bf16.mxu0 %v2067_v15 }
 0x36b   :  { %1272 = vmatpush1.bf16.msra.mxu0 %v2065_v16 }
 0x36c   :  { %1273 = vmatprep.subr.bf16.mxu0 %v2070_v18 }
 0x36f   :  { %1274 = vmatpush1.bf16.msra.mxu0 %v2068_v19 }
 0x370   :  { %1275 = vmatprep.subr.bf16.mxu0 %v2073_v20 }
 0x373   :  { %1276 = vmatpush1.bf16.msra.mxu0 %v2071_v21 }
 0x374   :  { %1277 = vmatprep.subr.bf16.mxu0 %v2076_v22 }
 0x377   :  { %1278 = vmatpush1.bf16.msra.mxu0 %v2074_v23 }
 0x378   :  { %1279 = vmatprep.subr.bf16.mxu0 %v2079_v26 }
 0x37b   :  { %1280 = vmatpush1.bf16.msra.mxu0 %v2077_v27 }
 0x37c   :  { %1281 = vmatprep.subr.bf16.mxu0 %v2082_v29 }
 0x37f   :  { %1282 = vmatpush1.bf16.msra.mxu0 %v2080_v30 }
 0x380   :  { %1283 = vmatprep.subr.bf16.mxu0 %v2085_v31 }
 0x383   :  { %1284 = vmatpush1.bf16.msra.mxu0 %v2083_v32 }
 0x386   :  { %1286 = vmatmul.mubr.bf16.vlgmr.msra.gmra.mrb[4].mxu0 %v812_v59  ;;  %v2108_v59 = vld [vmem:[%s2730_s14 + $0x30] sm:$0xff]   ;;  %s2304_s14 = smov [#allocation13]  }
 0x459   :  { %v1287_v41 = vpop.f32.mrb[4].mxu0 }
 0x45a   :  { %v1896_v42 = vadd.f32 %v1287_v41, %v883_v39  ;;  %v1289_v43 = vpop.f32.mrb[5].mxu0 }
 0x45b   :  { %v1897_v44 = vadd.f32 %v1289_v43, %v887_v40  ;;  %v1291_v46 = vpop.f32.mrb[6].mxu0 }
 0x45c   :  { %v1898_v47 = vadd.f32 %v1291_v46, %v883_v39  ;;  %v1293_v48 = vpop.f32.mrb[7].mxu0  ;;  %v1296_v50 = vmax.f32 %v1896_v42, 0.0 }
 0x45d   :  { %v1899_v49 = vadd.f32 %v1293_v48, %v887_v40  ;;  %v1297_v52 = vmax.f32 %v1897_v44, 0.0 }
 0x45e   :  { %v1298_v51 = vmax.f32 %v1898_v47, 0.0 }
 0x45f   :  { %v1299_v53 = vmax.f32 %v1899_v49, 0.0 }
 0x460   :  { %v1300_v54 = vpack.c.bf16 %v1298_v51, %v1296_v50 }
 0x461   :  { %v1301_v55 = vpack.c.bf16 %v1299_v53, %v1297_v52 }
 0x463   :  { %1469 = vmatprep.mubr.bf16.mxu1 %v1301_v55 }
 0x464   :  { %1470 = vmatmul.mubr.bf16.vlgmr.msra.gmra.mrb[12].mxu1 %v1300_v54 }
 0x465   :  { %1877 = vmatpush3.bf16.msra.mxu1 %v2102_v25  ;;  %1892 = vmatprep.mubr.msk.bf16.mxu1 %vm2299_vm0, %v2298_v17 }
 0x466   :  { %1878 = vmatprep.subr.bf16.mxu1 %v2298_v17 }
 0x469   :  { %1879 = vmatpush3.bf16.msra.mxu1 %v2103_v24 }
 0x46a   :  { %1880 = vmatprep.subr.bf16.mxu1 %v2298_v17 }
 0x46d   :  { %1881 = vmatpush3.bf16.msra.mxu1 %v2104_v28 }
 0x46e   :  { %1882 = vmatprep.subr.bf16.mxu1 %v2298_v17 }
 0x471   :  { %1883 = vmatpush3.bf16.msra.mxu1 %v2105_v56 }
 0x472   :  { %1884 = vmatprep.subr.bf16.mxu1 %v2298_v17 }
 0x475   :  { %1885 = vmatpush3.bf16.msra.mxu1 %v2106_v57 }
 0x476   :  { %1886 = vmatprep.subr.bf16.mxu1 %v2298_v17 }
 0x479   :  { %1887 = vmatpush3.bf16.msra.mxu1 %v2107_v58 }
 0x47a   :  { %1888 = vmatprep.subr.bf16.mxu1 %v2298_v17 }
 0x47d   :  { %1889 = vmatpush3.bf16.msra.mxu1 %v2108_v59 }
 0x47e   :  { %1890 = vmatprep.subr.bf16.mxu1 %v2298_v17  ;;  %v1816_v17 = vld [vmem:[%s2738_s9] ss:$0 sm:$0xff] }
 0x481   :  { %1891 = vmatpush3.bf16.msra.mxu1 %v2109_v60 }
 0x537   :  { %v1847_v61 = vpop.f32.mrb[12].mxu1 }
 0x538   :  { %v1848_v63 = vpop.f32.mrb[13].mxu1 }
 0x539   :  { %v1849_v45 = vadd.f32 %v1848_v63, %v1847_v61  ;;  %v1850_v0 = vpop.f32.mrb[14].mxu1 }
 0x53a   :  { %v1851_v1 = vpop.f32.mrb[15].mxu1 }
 0x53b   :  { %v1472_v2 = vadd.f32 %v1849_v45, %v1799_v62  ;;  %v1852_v3 = vadd.f32 %v1851_v1, %v1850_v0 }
 0x53d   :  { %v1475_v4 = vadd.f32 %v1852_v3, %v1799_v62  ;;  %v1478_v5 = vmax.f32 %v1472_v2, 0.0 }
 0x53f   :  { %v1479_v6 = vmax.f32 %v1475_v4, 0.0 }
 0x541   :  { %v1480_v7 = vpack.c.bf16 %v1479_v6, %v1478_v5 }
 0x543   :  { %1893 = vmatmul.mubr.bf16.vlgmr.msra.gmra.mrb[16].mxu1 %v1480_v7 }
 0x616   :  { %v1586_v8 = vpop.f32.mrb[16].mxu1 }
 0x617   :  { %v1587_v9 = vadd.f32 %v1816_v17, %v1586_v8  ;;  %v1894_v10 = vpop.f32.mrb[17].mxu1 }
 0x618   :  { %v1589_v11 = vpop.f32.mrb[18].mxu1 }
 0x619   :  { %v1593_v12 = vmax.f32 %v1587_v9, 0.0  ;;  %v1590_v13 = vadd.f32 %v1816_v17, %v1589_v11  ;;  %v1895_v14 = vpop.f32.mrb[19].mxu1 }
 0x61b   :  { %v1594_v15 = vmax.f32 %v1590_v13, 0.0  ;;  %v1611_v16 = vmul.f32 %v1593_v12, %v1593_v12 }
 0x61d   :  { %1621 = vrot.lane.b32.xlu1 %v1611_v16, %s2301_s24  ;;  %v1612_v18 = vmul.f32 %v1594_v15, %v1594_v15  ;;  %v1613_v20 = vsel %vm441_vm4, %v1611_v16, 0.0 }
 0x61f   :  { %1623 = vrot.lane.b32.xlu0 %v1612_v18, %s2301_s24  ;;  %v1616_v19 = vsel %vm441_vm4, %v1612_v18, 0.0 }
 0x621   :  { %1597 = vrot.lane.b32.xlu1 %v1593_v12, %s2301_s24 }
 0x623   :  { %1599 = vrot.lane.b32.xlu0 %v1594_v15, %s2301_s24  ;;  %s1656_s24 = sshll.u32 %s2304_s14, 4  ;;  %s1657_s24 = int_to_ptr.vmem [resolvable:$true] %s1656_s24 }
 0x624   :  { %s2256_s13 = scalar_lea.vmem %s1657_s24, 256  ;;  %p2261_p4 = scmp.lt.s32.totalorder %s1657_s24, %s1657_s24 }
 0x625   :  { %p2257_p3 = scmp.ne.s32.totalorder %s1657_s24, %s2256_s13  ;;  %p2262_p5 = scmp.lt.s32.totalorder %s2256_s13, %s2256_s13 }
 0x627   :  { %p2263_p6 = por %p2262_p5, %p2261_p4 }
 0x629   :  { %p2264_p7 = pnand %p2263_p6, %p2257_p3 }
 0x642   :  { %1617 = vadd.xlane.f32.xlu0 %v1616_v19 }
 0x645   :  { %1614 = vadd.xlane.f32.xlu1 %v1613_v20 }
 0x68f   :  { %v1622_v21 = vpop.permute.xlu1 %1621 }
 0x690   :  { %v1627_v22 = vsel %vm441_vm4, %v1622_v21, 0.0 }
 0x691   :  { %v1624_v23 = vpop.permute.xlu0 %1623  ;;  %1628 = vadd.xlane.f32.xlu0 %v1627_v22 }
 0x692   :  { %v1630_v26 = vsel %vm441_vm4, %v1624_v23, 0.0 }
 0x693   :  { %v1598_v27 = vpop.permute.xlu1 %1597  ;;  %1631 = vadd.xlane.f32.xlu1 %v1630_v26 }
 0x694   :  { %v1603_v29 = vmul.f32 %v1598_v27, %v1593_v12 }
 0x695   :  { %v1600_v30 = vpop.permute.xlu0 %1599 }
 0x696   :  { %v1604_v31 = vmul.f32 %v1600_v30, %v1594_v15  ;;  %v1605_v32 = vsel %vm441_vm4, %v1603_v29, 0.0 }
 0x697   :  { %1606 = vadd.xlane.f32.xlu0 %v1605_v32 }
 0x698   :  { %v1608_v33 = vsel %vm441_vm4, %v1604_v31, 0.0 }
 0x699   :  { %1609 = vadd.xlane.f32.xlu1 %v1608_v33 }
 0x6cf   :  { %v1618_v35 = vpop.xlane.xlu0 %1617 }
 0x6d0   :  { %v1634_v37 = vmax.f32 %v1618_v35, 1e-16 }
 0x6d2   :  { %v1615_v34 = vpop.xlane.xlu1 %1614 }
 0x6d3   :  { %v1633_v36 = vmax.f32 %v1615_v34, 1e-16 }
 0x6d5   :  { %2126 = vrsqrt.f32 %v1633_v36 }
 0x6df   :  { %v2127_v42 = vpop.eup %2126 }
 0x71e   :  { %v1629_v38 = vpop.xlane.xlu0 %1628 }
 0x71f   :  { %v1637_v39 = vmax.f32 %v1629_v38, 1e-16 }
 0x720   :  { %v1632_v40 = vpop.xlane.xlu1 %1631 }
 0x721   :  { %2128 = vrsqrt.f32 %v1637_v39  ;;  %v1638_v41 = vmax.f32 %v1632_v40, 1e-16 }
 0x722   :  { %2130 = vrsqrt.f32 %v1634_v37 }
 0x723   :  { %2132 = vrsqrt.f32 %v1638_v41 }
 0x724   :  { %v1607_v48 = vpop.xlane.xlu0 %1606 }
 0x726   :  { %v1610_v51 = vpop.xlane.xlu1 %1609 }
 0x72b   :  { %v2129_v43 = vpop.eup %2128 }
 0x72c   :  { %v2131_v44 = vpop.eup %2130  ;;  %v1641_v46 = vmul.f32 %v2129_v43, %v2127_v42 }
 0x72d   :  { %v2133_v47 = vpop.eup %2132 }
 0x72e   :  { %v1643_v49 = vmul.f32 %v1641_v46, %v1607_v48  ;;  %v1642_v50 = vmul.f32 %v2133_v47, %v2131_v44 }
 0x730   :  { %v1645_v52 = vmul.f32 5.0, %v1643_v49  ;;  %v1644_v53 = vmul.f32 %v1642_v50, %v1610_v51 }
 0x732   :  { %v1646_v54 = vmul.f32 5.0, %v1644_v53  ;;  %v1647_v55 = vsel %vm339_vm3, %v1593_v12, %v1645_v52 }
 0x733   :  { %1649 = vst [vmem:[#allocation13] sm:$0xff] %v1647_v55 }
 0x734   :  { %v1648_v25 = vsel %vm339_vm3, %v1594_v15, %v1646_v54 }
 0x735   :  { %1650 = vst [vmem:[#allocation13 + $0x8] sm:$0xff] %v1648_v25 }
 0x736   :  { %2267 = shalt.err (!%p2264_p7)
}
 0x737   :  { %s2739_s5 = sld [smem:[#allocation21_spill]] }
 0x73d   :  { %s2268_s21 = scalar_lea.hbm %s2739_s5, 256 }
 0x73e   :  { %p2269_p8 = scmp.ne.s32.totalorder %s2739_s5, %s2268_s21  ;;  %p2272_p9 = scmp.lt.u32.totalorder %s2268_s21, %s2739_s5 }
 0x740   :  { %p2274_p10 = pnand %p2272_p9, %p2269_p8 }
 0x742   :  { %2277 = shalt.err (!%p2274_p10)
}
 0x743   :  { %1662 = dma.vmem_to_hbm [thread:$0]  %s1657_s24, 256, %s2739_s5, [#allocation4], %s2295_s6, %s2295_s6, %s2296_s17  }
 0x744   :  { %2286 = dma.done.wait [#allocation4], 256  }
 0x745   :  { %2287 = vsyncadd [#allocation4], 4294967040 }
 0x746   :  { %1666 = vsyncpa [#allocation3], 1 }
 0x747   :  { %1667 = vsyncpa [#allocation8], 1 }
 0x748   :  { %1668 = vsyncpa [#allocation11], 1 }
 0x749   :  { %1669 = vsyncpa [#allocation4], 1 }
 0x74a   :  { %1670 = vsyncpa [#allocation5], 1 }

</bundles_post_ra>
